<compile_context>
chip_gen: v7x
topology: tpu7x:2x2x1
jax: 0.10.0
libtpu: 0.0.40
codegen_flags: <defaults>
</compile_context>

<pallas_src>
import jax
import jax.numpy as jnp
from jax.experimental import pallas as pl
from jax.experimental.pallas import tpu as pltpu


def _round_up(x, m):
    return ((x + m - 1) // m) * m


_GATE_PERM = (0, 1, 3, 2)  # PyTorch [i, f, g, o] -> [i, f, o, g]


def _pack_gate_w(w, hidden, gate_p, din):
    """Torch gate weight (4H, Din) -> reordered [i,f,o,g], padded, transposed (Din, G) bf16."""
    w4 = w.reshape(4, hidden, din)[jnp.array(_GATE_PERM)]
    wcat = w4.reshape(4 * hidden, din)
    wp = jnp.zeros((gate_p, din), jnp.float32).at[:4 * hidden].set(wcat)
    return jnp.transpose(wp).astype(jnp.bfloat16)                     # (Din, G)


def _pack_gate_b(b_ih, b_hh, hidden, gate_p):
    b4 = (b_ih + b_hh).reshape(4, hidden)[jnp.array(_GATE_PERM)]
    return jnp.zeros((1, gate_p), jnp.float32).at[0, :4 * hidden].set(b4.reshape(-1))


# ------------------------------ Fused kernel ----------------------------------
def _fused_forward(x2d, wih1, whh1, b1, wih2, whh2, b2, wlin, blin,
                   *, seq_len, batch_p, hidden, gate_p, out_p):
    T, Bp, H, G, Op = seq_len, batch_p, hidden, gate_p, out_p
    rows = T * Bp

    def kernel(x_ref, wih1_ref, whh1_ref, b1_ref, wih2_ref, whh2_ref, b2_ref,
               wlin_ref, blin_ref, out_ref, xp_ref, h2_ref):
        # Loop-invariant operands hoisted once; bf16 (H, G) weights are ~2
        # vregs each, so they stay resident across the unrolled recurrence.
        whh1 = whh1_ref[...]
        wih2 = wih2_ref[...]
        whh2 = whh2_ref[...]
        b2b = jnp.broadcast_to(b2_ref[...], (Bp, G))   # hoisted broadcast

        # Layer-1 input projection hoisted out of the recurrence:
        #   xp[t*Bp:(t+1)*Bp, :] = x[t] @ W_ih1^T + (b_ih1 + b_hh1)
        xp_ref[...] = (jnp.dot(x_ref[...], wih1_ref[...],
                               preferred_element_type=jnp.float32) + b1_ref[...])

        def lstm_gates(gates, c):
            # Gate order [i, f, o, g]: one fused sigmoid + one tanh (f32 math).
            sig = jax.nn.sigmoid(gates[:, :3 * H])
            i_g = sig[:, 0 * H:1 * H]
            f_g = sig[:, 1 * H:2 * H]
            o_g = sig[:, 2 * H:3 * H]
            g_g = jnp.tanh(gates[:, 3 * H:4 * H])
            c_new = f_g * c + i_g * g_g
            h_new = o_g * jnp.tanh(c_new)
            return h_new, c_new

        def l1_cell(row, h, c):
            gates = xp_ref[pl.ds(row, Bp), :] + jnp.dot(
                h.astype(jnp.bfloat16), whh1, preferred_element_type=jnp.float32)
            return lstm_gates(gates, c)

        def l2_cell(row, h_in, h, c):
            gates = (b2b
                     + jnp.dot(h_in.astype(jnp.bfloat16), wih2,
                               preferred_element_type=jnp.float32)
                     + jnp.dot(h.astype(jnp.bfloat16), whh2,
                               preferred_element_type=jnp.float32))
            h_new, c_new = lstm_gates(gates, c)
            h2_ref[pl.ds(row, Bp), :] = h_new
            return h_new, c_new

        zeros = jnp.zeros((Bp, H), jnp.float32)

        # Wavefront prologue: layer-1 step 0.
        h1, c1 = l1_cell(0, zeros, zeros)

        # Skewed loop: iteration t runs layer-1 step t and layer-2 step t-1
        # (two independent MXU chains per iteration -> serial chain ~T+1).
        def step(t, carry):
            h1, c1, h2, c2 = carry
            r1 = pl.multiple_of(t * Bp, Bp)
            r0 = pl.multiple_of((t - 1) * Bp, Bp)
            nh1, nc1 = l1_cell(r1, h1, c1)
            nh2, nc2 = l2_cell(r0, h1, h2, c2)
            return nh1, nc1, nh2, nc2

        # Full unroll at small T (LLO visibility); partial unroll at large T to
        # bound instruction memory / compile time.
        h1, c1, h2, c2 = jax.lax.fori_loop(
            1, T, step, (h1, c1, zeros, zeros),
            unroll=(True if T <= 32 else 8))

        # Wavefront epilogue: layer-2 step T-1.
        l2_cell((T - 1) * Bp, h1, h2, c2)

        # Final linear over the whole h2 sequence (lane-dense Op-wide store).
        out_ref[...] = (jnp.dot(h2_ref[...].astype(jnp.bfloat16), wlin_ref[...],
                                preferred_element_type=jnp.float32) + blin_ref[...])

    # TODO(synk): for long sequences, chunk T over a grid axis ("arbitrary",
    # h/c carried in small scratch) and set pltpu.CompilerParams(vmem_limit_bytes=...)
    # so the T*Bp-resident scratch also fits v7x's smaller VMEM.
    return pl.pallas_call(
        kernel,
        out_shape=jax.ShapeDtypeStruct((rows, Op), jnp.float32),
        scratch_shapes=[
            pltpu.VMEM((rows, G), jnp.float32),   # hoisted layer-1 gate projections
            pltpu.VMEM((rows, H), jnp.float32),   # layer-2 hidden sequence
        ],
    )(x2d, wih1, whh1, b1, wih2, whh2, b2, wlin, blin)


# --------------------------------- Forward ------------------------------------
def hypernym_hyponym_lstm_forward(params, hyponym):
    T, B = hyponym.shape
    E = params["embedding"].shape[1]
    H = params["w_hh1"].shape[1]
    O = params["w_lin"].shape[0]

    Bp = _round_up(B, 8)          # f32 sublane multiple
    G = _round_up(4 * H, 128)     # concatenated gate width -> lane tile(s)
    Op = _round_up(O, 128)        # lane-dense final store

    # Embedding lookup (gather) stays in plain-JAX glue.
    # TODO(synk): at larger T/vocab, move the gather in-kernel via scalar-
    # prefetched token ids (PrefetchScalarGridSpec + pl.Element row gather).
    emb = jnp.take(params["embedding"], hyponym, axis=0)              # (T, B, E)
    emb_p = jnp.zeros((T, Bp, E), jnp.float32).at[:, :B, :].set(emb)  # pad batch
    x2d = emb_p.reshape(T * Bp, E).astype(jnp.bfloat16)

    wih1 = _pack_gate_w(params["w_ih1"], H, G, E)                     # (E, G)  bf16
    whh1 = _pack_gate_w(params["w_hh1"], H, G, H)                     # (H, G)  bf16
    b1 = _pack_gate_b(params["b_ih1"], params["b_hh1"], H, G)         # (1, G)  f32
    wih2 = _pack_gate_w(params["w_ih2"], H, G, H)                     # (H, G)  bf16
    whh2 = _pack_gate_w(params["w_hh2"], H, G, H)                     # (H, G)  bf16
    b2 = _pack_gate_b(params["b_ih2"], params["b_hh2"], H, G)         # (1, G)  f32

    wlin = jnp.zeros((H, Op), jnp.float32).at[:, :O].set(
        jnp.transpose(params["w_lin"])).astype(jnp.bfloat16)          # (H, Op) bf16
    blin = jnp.zeros((1, Op), jnp.float32).at[0, :O].set(params["b_lin"])

    out = _fused_forward(x2d, wih1, whh1, b1, wih2, whh2, b2, wlin, blin,
                         seq_len=T, batch_p=Bp, hidden=H, gate_p=G, out_p=Op)
    return out.reshape(T, Bp, Op)[:, :B, :O]                          # (T, B, num_hypernyms)
    # NOTE: self.sigmoid is defined in the PyTorch module but never applied in forward.


# ------------------------------ Pure-JAX reference -----------------------------
def lstm_ref(x, w_ih, w_hh, b_ih, b_hh):
    H = w_hh.shape[1]
    B = x.shape[1]

    def step(carry, x_t):
        h, c = carry
        gates = x_t @ w_ih.T + h @ w_hh.T + b_ih + b_hh
        i, f, g, o = jnp.split(gates, 4, axis=-1)
        i, f, o = jax.nn.sigmoid(i), jax.nn.sigmoid(f), jax.nn.sigmoid(o)
        g = jnp.tanh(g)
        c = f * c + i * g
        h = o * jnp.tanh(c)
        return (h, c), h

    init = (jnp.zeros((B, H), jnp.float32), jnp.zeros((B, H), jnp.float32))
    _, ys = jax.lax.scan(step, init, x)
    return ys


def forward_ref(params, hyponym):
    emb = jnp.take(params["embedding"], hyponym, axis=0)
    h1 = lstm_ref(emb, params["w_ih1"], params["w_hh1"], params["b_ih1"], params["b_hh1"])
    h2 = lstm_ref(h1, params["w_ih2"], params["w_hh2"], params["b_ih2"], params["b_hh2"])
    return h2 @ params["w_lin"].T + params["b_lin"]


# --------------------------------- Params -------------------------------------
def init_params(key, num_hyponyms, num_hypernyms, embedding_dim, hidden_dim):
    ks = jax.random.split(key, 11)
    bound = 1.0 / jnp.sqrt(jnp.float32(hidden_dim))

    def u(k, shape):
        return jax.random.uniform(k, shape, jnp.float32, -bound, bound)

    H = hidden_dim
    return dict(
        embedding=jax.random.normal(ks[0], (num_hyponyms, embedding_dim), jnp.float32),
        w_ih1=u(ks[1], (4 * H, embedding_dim)), w_hh1=u(ks[2], (4 * H, H)),
        b_ih1=u(ks[3], (4 * H,)), b_hh1=u(ks[4], (4 * H,)),
        w_ih2=u(ks[5], (4 * H, H)), w_hh2=u(ks[6], (4 * H, H)),
        b_ih2=u(ks[7], (4 * H,)), b_hh2=u(ks[8], (4 * H,)),
        w_lin=u(ks[9], (num_hypernyms, H)), b_lin=u(ks[10], (num_hypernyms,)),
    )


if __name__ == "__main__":
    num_hyponyms, num_hypernyms = 50, 16
    embedding_dim, hidden_dim = 32, 32
    seq_len, batch = 8, 4

    key = jax.random.PRNGKey(0)
    pkey, ikey = jax.random.split(key)
    params = init_params(pkey, num_hyponyms, num_hypernyms, embedding_dim, hidden_dim)
    hyponym = jax.random.randint(ikey, (seq_len, batch), 0, num_hyponyms, dtype=jnp.int32)

    fwd = jax.jit(hypernym_hyponym_lstm_forward)
    out = jax.block_until_ready(fwd(params, hyponym))
    ref = jax.block_until_ready(forward_ref(params, hyponym))

    assert out.shape == (seq_len, batch, num_hypernyms), out.shape
    # Tolerance relaxed vs. the pure-f32 version: kernel matmul inputs are bf16
    # (f32 accumulation), per the perf review; the reference stays full f32.
    err = float(jnp.max(jnp.abs(out - ref)))
    assert jnp.allclose(out, ref, atol=2e-2, rtol=2e-2), err
    print("KERNEL_OK")
</pallas_src>

<mosaic_0001>
module attributes {stable_mosaic.version = 11 : i64} {
  func.func @kernel(%arg0: memref<64x32xbf16, #tpu.memory_space<vmem>>, %arg1: memref<32x128xbf16, #tpu.memory_space<vmem>>, %arg2: memref<32x128xbf16, #tpu.memory_space<vmem>>, %arg3: memref<1x128xf32, #tpu.memory_space<vmem>>, %arg4: memref<32x128xbf16, #tpu.memory_space<vmem>>, %arg5: memref<32x128xbf16, #tpu.memory_space<vmem>>, %arg6: memref<1x128xf32, #tpu.memory_space<vmem>>, %arg7: memref<32x128xbf16, #tpu.memory_space<vmem>>, %arg8: memref<1x128xf32, #tpu.memory_space<vmem>>, %arg9: memref<64x128xf32, #tpu.memory_space<vmem>>, %arg10: memref<64x128xf32, #tpu.memory_space<vmem>>, %arg11: memref<64x32xf32, #tpu.memory_space<vmem>>) attributes {dimension_semantics = [], scalar_prefetch = 0 : i64, scratch_operands = 2 : i64, tpu.core_type = #tpu.core_type<tc>} {
    %c0 = arith.constant 0 : index
    %c0_0 = arith.constant 0 : index
    %0 = vector.load %arg2[%c0, %c0_0] : memref<32x128xbf16, #tpu.memory_space<vmem>>, vector<32x128xbf16>
    %c0_1 = arith.constant 0 : index
    %c0_2 = arith.constant 0 : index
    %1 = vector.load %arg4[%c0_1, %c0_2] : memref<32x128xbf16, #tpu.memory_space<vmem>>, vector<32x128xbf16>
    %c0_3 = arith.constant 0 : index
    %c0_4 = arith.constant 0 : index
    %2 = vector.load %arg5[%c0_3, %c0_4] : memref<32x128xbf16, #tpu.memory_space<vmem>>, vector<32x128xbf16>
    %c0_5 = arith.constant 0 : index
    %c0_6 = arith.constant 0 : index
    %3 = vector.load %arg6[%c0_5, %c0_6] : memref<1x128xf32, #tpu.memory_space<vmem>>, vector<1x128xf32>
    %4 = vector.shape_cast %3 : vector<1x128xf32> to vector<1x128xf32>
    %5 = vector.broadcast %4 : vector<1x128xf32> to vector<8x128xf32>
    %c0_7 = arith.constant 0 : index
    %c0_8 = arith.constant 0 : index
    %6 = vector.load %arg0[%c0_7, %c0_8] : memref<64x32xbf16, #tpu.memory_space<vmem>>, vector<64x32xbf16>
    %c0_9 = arith.constant 0 : index
    %c0_10 = arith.constant 0 : index
    %7 = vector.load %arg1[%c0_9, %c0_10] : memref<32x128xbf16, #tpu.memory_space<vmem>>, vector<32x128xbf16>
    %cst = arith.constant dense<0.000000e+00> : vector<64x128xf32>
    %8 = tpu.matmul %6, %7, %cst {dimension_numbers = #tpu.dot_dimension_numbers<[1], [0], [0], [1], [0, 0, 1, 1], [], []>} : vector<64x32xbf16>, vector<32x128xbf16>, vector<64x128xf32> -> vector<64x128xf32>
    %c0_11 = arith.constant 0 : index
    %c0_12 = arith.constant 0 : index
    %9 = vector.load %arg3[%c0_11, %c0_12] : memref<1x128xf32, #tpu.memory_space<vmem>>, vector<1x128xf32>
    %10 = vector.broadcast %9 : vector<1x128xf32> to vector<64x128xf32>
    %11 = arith.addf %8, %10 : vector<64x128xf32>
    %c0_13 = arith.constant 0 : index
    %c0_14 = arith.constant 0 : index
    %12 = vector.load %arg10[%c0_13, %c0_14] : memref<64x128xf32, #tpu.memory_space<vmem>>, vector<64x128xf32>
    tpu.vector_store %arg10[%c0_13, %c0_14], %11 {strides = array<i32>} : memref<64x128xf32, #tpu.memory_space<vmem>>, vector<64x128xf32>,
    %cst_15 = arith.constant 0.000000e+00 : f32
    %13 = vector.broadcast %cst_15 : f32 to vector<8x32xf32>
    %c0_16 = arith.constant 0 : index
    %c0_17 = arith.constant 0 : index
    %14 = vector.load %arg10[%c0_16, %c0_17] : memref<64x128xf32, #tpu.memory_space<vmem>>, vector<8x128xf32>
    %15 = arith.truncf %13 : vector<8x32xf32> to vector<8x32xbf16>
    %cst_18 = arith.constant dense<0.000000e+00> : vector<8x128xf32>
    %16 = tpu.matmul %15, %0, %cst_18 {dimension_numbers = #tpu.dot_dimension_numbers<[1], [0], [0], [1], [0, 0, 1, 1], [], []>} : vector<8x32xbf16>, vector<32x128xbf16>, vector<8x128xf32> -> vector<8x128xf32>
    %17 = arith.addf %14, %16 : vector<8x128xf32>
    %18 = vector.extract_strided_slice %17 {offsets = [0, 0], sizes = [8, 96], strides = [1, 1]} : vector<8x128xf32> to vector<8x96xf32>
    %19 = arith.negf %18 : vector<8x96xf32>
    %20 = math.exp %19 : vector<8x96xf32>
    %cst_19 = arith.constant 1.000000e+00 : f32
    %21 = vector.broadcast %cst_19 : f32 to vector<8x96xf32>
    %22 = arith.addf %21, %20 : vector<8x96xf32>
    %23 = arith.divf %21, %22 : vector<8x96xf32>
    %24 = vector.extract_strided_slice %23 {offsets = [0, 0], sizes = [8, 32], strides = [1, 1]} : vector<8x96xf32> to vector<8x32xf32>
    %25 = vector.extract_strided_slice %23 {offsets = [0, 32], sizes = [8, 32], strides = [1, 1]} : vector<8x96xf32> to vector<8x32xf32>
    %26 = vector.extract_strided_slice %23 {offsets = [0, 64], sizes = [8, 32], strides = [1, 1]} : vector<8x96xf32> to vector<8x32xf32>
    %27 = vector.extract_strided_slice %17 {offsets = [0, 96], sizes = [8, 32], strides = [1, 1]} : vector<8x128xf32> to vector<8x32xf32>
    %28 = math.tanh %27 : vector<8x32xf32>
    %29 = arith.mulf %25, %13 : vector<8x32xf32>
    %30 = arith.mulf %24, %28 : vector<8x32xf32>
    %31 = arith.addf %29, %30 : vector<8x32xf32>
    %32 = math.tanh %31 : vector<8x32xf32>
    %33 = arith.mulf %26, %32 : vector<8x32xf32>
    %c1_i32 = arith.constant 1 : i32
    %c8_i32 = arith.constant 8 : i32
    %34 = arith.muli %c1_i32, %c8_i32 : i32
    %35 = tpu.assume_multiple %34, 8 : i32
    %c1_i32_20 = arith.constant 1 : i32
    %36 = arith.subi %c1_i32, %c1_i32_20 : i32
    %c8_i32_21 = arith.constant 8 : i32
    %37 = arith.muli %36, %c8_i32_21 : i32
    %38 = tpu.assume_multiple %37, 8 : i32
    %39 = arith.index_cast %35 : i32 to index
    %c0_22 = arith.constant 0 : index
    %40 = vector.load %arg10[%39, %c0_22] : memref<64x128xf32, #tpu.memory_space<vmem>>, vector<8x128xf32>
    %41 = arith.truncf %33 : vector<8x32xf32> to vector<8x32xbf16>
    %cst_23 = arith.constant dense<0.000000e+00> : vector<8x128xf32>
    %42 = tpu.matmul %41, %0, %cst_23 {dimension_numbers = #tpu.dot_dimension_numbers<[1], [0], [0], [1], [0, 0, 1, 1], [], []>} : vector<8x32xbf16>, vector<32x128xbf16>, vector<8x128xf32> -> vector<8x128xf32>
    %43 = arith.addf %40, %42 : vector<8x128xf32>
    %44 = vector.extract_strided_slice %43 {offsets = [0, 0], sizes = [8, 96], strides = [1, 1]} : vector<8x128xf32> to vector<8x96xf32>
    %45 = arith.negf %44 : vector<8x96xf32>
    %46 = math.exp %45 : vector<8x96xf32>
    %cst_24 = arith.constant 1.000000e+00 : f32
    %47 = vector.broadcast %cst_24 : f32 to vector<8x96xf32>
    %48 = arith.addf %47, %46 : vector<8x96xf32>
    %49 = arith.divf %47, %48 : vector<8x96xf32>
    %50 = vector.extract_strided_slice %49 {offsets = [0, 0], sizes = [8, 32], strides = [1, 1]} : vector<8x96xf32> to vector<8x32xf32>
    %51 = vector.extract_strided_slice %49 {offsets = [0, 32], sizes = [8, 32], strides = [1, 1]} : vector<8x96xf32> to vector<8x32xf32>
    %52 = vector.extract_strided_slice %49 {offsets = [0, 64], sizes = [8, 32], strides = [1, 1]} : vector<8x96xf32> to vector<8x32xf32>
    %53 = vector.extract_strided_slice %43 {offsets = [0, 96], sizes = [8, 32], strides = [1, 1]} : vector<8x128xf32> to vector<8x32xf32>
    %54 = math.tanh %53 : vector<8x32xf32>
    %55 = arith.mulf %51, %31 : vector<8x32xf32>
    %56 = arith.mulf %50, %54 : vector<8x32xf32>
    %57 = arith.addf %55, %56 : vector<8x32xf32>
    %58 = math.tanh %57 : vector<8x32xf32>
    %59 = arith.mulf %52, %58 : vector<8x32xf32>
    %60 = arith.truncf %33 : vector<8x32xf32> to vector<8x32xbf16>
    %cst_25 = arith.constant dense<0.000000e+00> : vector<8x128xf32>
    %61 = tpu.matmul %60, %1, %cst_25 {dimension_numbers = #tpu.dot_dimension_numbers<[1], [0], [0], [1], [0, 0, 1, 1], [], []>} : vector<8x32xbf16>, vector<32x128xbf16>, vector<8x128xf32> -> vector<8x128xf32>
    %62 = arith.addf %5, %61 : vector<8x128xf32>
    %63 = arith.truncf %13 : vector<8x32xf32> to vector<8x32xbf16>
    %cst_26 = arith.constant dense<0.000000e+00> : vector<8x128xf32>
    %64 = tpu.matmul %63, %2, %cst_26 {dimension_numbers = #tpu.dot_dimension_numbers<[1], [0], [0], [1], [0, 0, 1, 1], [], []>} : vector<8x32xbf16>, vector<32x128xbf16>, vector<8x128xf32> -> vector<8x128xf32>
    %65 = arith.addf %62, %64 : vector<8x128xf32>
    %66 = vector.extract_strided_slice %65 {offsets = [0, 0], sizes = [8, 96], strides = [1, 1]} : vector<8x128xf32> to vector<8x96xf32>
    %67 = arith.negf %66 : vector<8x96xf32>
    %68 = math.exp %67 : vector<8x96xf32>
    %cst_27 = arith.constant 1.000000e+00 : f32
    %69 = vector.broadcast %cst_27 : f32 to vector<8x96xf32>
    %70 = arith.addf %69, %68 : vector<8x96xf32>
    %71 = arith.divf %69, %70 : vector<8x96xf32>
    %72 = vector.extract_strided_slice %71 {offsets = [0, 0], sizes = [8, 32], strides = [1, 1]} : vector<8x96xf32> to vector<8x32xf32>
    %73 = vector.extract_strided_slice %71 {offsets = [0, 32], sizes = [8, 32], strides = [1, 1]} : vector<8x96xf32> to vector<8x32xf32>
    %74 = vector.extract_strided_slice %71 {offsets = [0, 64], sizes = [8, 32], strides = [1, 1]} : vector<8x96xf32> to vector<8x32xf32>
    %75 = vector.extract_strided_slice %65 {offsets = [0, 96], sizes = [8, 32], strides = [1, 1]} : vector<8x128xf32> to vector<8x32xf32>
    %76 = math.tanh %75 : vector<8x32xf32>
    %77 = arith.mulf %73, %13 : vector<8x32xf32>
    %78 = arith.mulf %72, %76 : vector<8x32xf32>
    %79 = arith.addf %77, %78 : vector<8x32xf32>
    %80 = math.tanh %79 : vector<8x32xf32>
    %81 = arith.mulf %74, %80 : vector<8x32xf32>
    %82 = arith.index_cast %38 : i32 to index
    %c0_28 = arith.constant 0 : index
    %83 = vector.load %arg11[%82, %c0_28] : memref<64x32xf32, #tpu.memory_space<vmem>>, vector<8x32xf32>
    tpu.vector_store %arg11[%82, %c0_28], %81 {strides = array<i32>} : memref<64x32xf32, #tpu.memory_space<vmem>>, vector<8x32xf32>,
    %c2_i32 = arith.constant 2 : i32
    %c8_i32_29 = arith.constant 8 : i32
    %84 = arith.muli %c2_i32, %c8_i32_29 : i32
    %85 = tpu.assume_multiple %84, 8 : i32
    %c1_i32_30 = arith.constant 1 : i32
    %86 = arith.subi %c2_i32, %c1_i32_30 : i32
    %c8_i32_31 = arith.constant 8 : i32
    %87 = arith.muli %86, %c8_i32_31 : i32
    %88 = tpu.assume_multiple %87, 8 : i32
    %89 = arith.index_cast %85 : i32 to index
    %c0_32 = arith.constant 0 : index
    %90 = vector.load %arg10[%89, %c0_32] : memref<64x128xf32, #tpu.memory_space<vmem>>, vector<8x128xf32>
    %91 = arith.truncf %59 : vector<8x32xf32> to vector<8x32xbf16>
    %cst_33 = arith.constant dense<0.000000e+00> : vector<8x128xf32>
    %92 = tpu.matmul %91, %0, %cst_33 {dimension_numbers = #tpu.dot_dimension_numbers<[1], [0], [0], [1], [0, 0, 1, 1], [], []>} : vector<8x32xbf16>, vector<32x128xbf16>, vector<8x128xf32> -> vector<8x128xf32>
    %93 = arith.addf %90, %92 : vector<8x128xf32>
    %94 = vector.extract_strided_slice %93 {offsets = [0, 0], sizes = [8, 96], strides = [1, 1]} : vector<8x128xf32> to vector<8x96xf32>
    %95 = arith.negf %94 : vector<8x96xf32>
    %96 = math.exp %95 : vector<8x96xf32>
    %cst_34 = arith.constant 1.000000e+00 : f32
    %97 = vector.broadcast %cst_34 : f32 to vector<8x96xf32>
    %98 = arith.addf %97, %96 : vector<8x96xf32>
    %99 = arith.divf %97, %98 : vector<8x96xf32>
    %100 = vector.extract_strided_slice %99 {offsets = [0, 0], sizes = [8, 32], strides = [1, 1]} : vector<8x96xf32> to vector<8x32xf32>
    %101 = vector.extract_strided_slice %99 {offsets = [0, 32], sizes = [8, 32], strides = [1, 1]} : vector<8x96xf32> to vector<8x32xf32>
    %102 = vector.extract_strided_slice %99 {offsets = [0, 64], sizes = [8, 32], strides = [1, 1]} : vector<8x96xf32> to vector<8x32xf32>
    %103 = vector.extract_strided_slice %93 {offsets = [0, 96], sizes = [8, 32], strides = [1, 1]} : vector<8x128xf32> to vector<8x32xf32>
    %104 = math.tanh %103 : vector<8x32xf32>
    %105 = arith.mulf %101, %57 : vector<8x32xf32>
    %106 = arith.mulf %100, %104 : vector<8x32xf32>
    %107 = arith.addf %105, %106 : vector<8x32xf32>
    %108 = math.tanh %107 : vector<8x32xf32>
    %109 = arith.mulf %102, %108 : vector<8x32xf32>
    %110 = arith.truncf %59 : vector<8x32xf32> to vector<8x32xbf16>
    %cst_35 = arith.constant dense<0.000000e+00> : vector<8x128xf32>
    %111 = tpu.matmul %110, %1, %cst_35 {dimension_numbers = #tpu.dot_dimension_numbers<[1], [0], [0], [1], [0, 0, 1, 1], [], []>} : vector<8x32xbf16>, vector<32x128xbf16>, vector<8x128xf32> -> vector<8x128xf32>
    %112 = arith.addf %5, %111 : vector<8x128xf32>
    %113 = arith.truncf %81 : vector<8x32xf32> to vector<8x32xbf16>
    %cst_36 = arith.constant dense<0.000000e+00> : vector<8x128xf32>
    %114 = tpu.matmul %113, %2, %cst_36 {dimension_numbers = #tpu.dot_dimension_numbers<[1], [0], [0], [1], [0, 0, 1, 1], [], []>} : vector<8x32xbf16>, vector<32x128xbf16>, vector<8x128xf32> -> vector<8x128xf32>
    %115 = arith.addf %112, %114 : vector<8x128xf32>
    %116 = vector.extract_strided_slice %115 {offsets = [0, 0], sizes = [8, 96], strides = [1, 1]} : vector<8x128xf32> to vector<8x96xf32>
    %117 = arith.negf %116 : vector<8x96xf32>
    %118 = math.exp %117 : vector<8x96xf32>
    %cst_37 = arith.constant 1.000000e+00 : f32
    %119 = vector.broadcast %cst_37 : f32 to vector<8x96xf32>
    %120 = arith.addf %119, %118 : vector<8x96xf32>
    %121 = arith.divf %119, %120 : vector<8x96xf32>
    %122 = vector.extract_strided_slice %121 {offsets = [0, 0], sizes = [8, 32], strides = [1, 1]} : vector<8x96xf32> to vector<8x32xf32>
    %123 = vector.extract_strided_slice %121 {offsets = [0, 32], sizes = [8, 32], strides = [1, 1]} : vector<8x96xf32> to vector<8x32xf32>
    %124 = vector.extract_strided_slice %121 {offsets = [0, 64], sizes = [8, 32], strides = [1, 1]} : vector<8x96xf32> to vector<8x32xf32>
    %125 = vector.extract_strided_slice %115 {offsets = [0, 96], sizes = [8, 32], strides = [1, 1]} : vector<8x128xf32> to vector<8x32xf32>
    %126 = math.tanh %125 : vector<8x32xf32>
    %127 = arith.mulf %123, %79 : vector<8x32xf32>
    %128 = arith.mulf %122, %126 : vector<8x32xf32>
    %129 = arith.addf %127, %128 : vector<8x32xf32>
    %130 = math.tanh %129 : vector<8x32xf32>
    %131 = arith.mulf %124, %130 : vector<8x32xf32>
    %132 = arith.index_cast %88 : i32 to index
    %c0_38 = arith.constant 0 : index
    %133 = vector.load %arg11[%132, %c0_38] : memref<64x32xf32, #tpu.memory_space<vmem>>, vector<8x32xf32>
    tpu.vector_store %arg11[%132, %c0_38], %131 {strides = array<i32>} : memref<64x32xf32, #tpu.memory_space<vmem>>, vector<8x32xf32>,
    %c3_i32 = arith.constant 3 : i32
    %c8_i32_39 = arith.constant 8 : i32
    %134 = arith.muli %c3_i32, %c8_i32_39 : i32
    %135 = tpu.assume_multiple %134, 8 : i32
    %c1_i32_40 = arith.constant 1 : i32
    %136 = arith.subi %c3_i32, %c1_i32_40 : i32
    %c8_i32_41 = arith.constant 8 : i32
    %137 = arith.muli %136, %c8_i32_41 : i32
    %138 = tpu.assume_multiple %137, 8 : i32
    %139 = arith.index_cast %135 : i32 to index
    %c0_42 = arith.constant 0 : index
    %140 = vector.load %arg10[%139, %c0_42] : memref<64x128xf32, #tpu.memory_space<vmem>>, vector<8x128xf32>
    %141 = arith.truncf %109 : vector<8x32xf32> to vector<8x32xbf16>
    %cst_43 = arith.constant dense<0.000000e+00> : vector<8x128xf32>
    %142 = tpu.matmul %141, %0, %cst_43 {dimension_numbers = #tpu.dot_dimension_numbers<[1], [0], [0], [1], [0, 0, 1, 1], [], []>} : vector<8x32xbf16>, vector<32x128xbf16>, vector<8x128xf32> -> vector<8x128xf32>
    %143 = arith.addf %140, %142 : vector<8x128xf32>
    %144 = vector.extract_strided_slice %143 {offsets = [0, 0], sizes = [8, 96], strides = [1, 1]} : vector<8x128xf32> to vector<8x96xf32>
    %145 = arith.negf %144 : vector<8x96xf32>
    %146 = math.exp %145 : vector<8x96xf32>
    %cst_44 = arith.constant 1.000000e+00 : f32
    %147 = vector.broadcast %cst_44 : f32 to vector<8x96xf32>
    %148 = arith.addf %147, %146 : vector<8x96xf32>
    %149 = arith.divf %147, %148 : vector<8x96xf32>
    %150 = vector.extract_strided_slice %149 {offsets = [0, 0], sizes = [8, 32], strides = [1, 1]} : vector<8x96xf32> to vector<8x32xf32>
    %151 = vector.extract_strided_slice %149 {offsets = [0, 32], sizes = [8, 32], strides = [1, 1]} : vector<8x96xf32> to vector<8x32xf32>
    %152 = vector.extract_strided_slice %149 {offsets = [0, 64], sizes = [8, 32], strides = [1, 1]} : vector<8x96xf32> to vector<8x32xf32>
    %153 = vector.extract_strided_slice %143 {offsets = [0, 96], sizes = [8, 32], strides = [1, 1]} : vector<8x128xf32> to vector<8x32xf32>
    %154 = math.tanh %153 : vector<8x32xf32>
    %155 = arith.mulf %151, %107 : vector<8x32xf32>
    %156 = arith.mulf %150, %154 : vector<8x32xf32>
    %157 = arith.addf %155, %156 : vector<8x32xf32>
    %158 = math.tanh %157 : vector<8x32xf32>
    %159 = arith.mulf %152, %158 : vector<8x32xf32>
    %160 = arith.truncf %109 : vector<8x32xf32> to vector<8x32xbf16>
    %cst_45 = arith.constant dense<0.000000e+00> : vector<8x128xf32>
    %161 = tpu.matmul %160, %1, %cst_45 {dimension_numbers = #tpu.dot_dimension_numbers<[1], [0], [0], [1], [0, 0, 1, 1], [], []>} : vector<8x32xbf16>, vector<32x128xbf16>, vector<8x128xf32> -> vector<8x128xf32>
    %162 = arith.addf %5, %161 : vector<8x128xf32>
    %163 = arith.truncf %131 : vector<8x32xf32> to vector<8x32xbf16>
    %cst_46 = arith.constant dense<0.000000e+00> : vector<8x128xf32>
    %164 = tpu.matmul %163, %2, %cst_46 {dimension_numbers = #tpu.dot_dimension_numbers<[1], [0], [0], [1], [0, 0, 1, 1], [], []>} : vector<8x32xbf16>, vector<32x128xbf16>, vector<8x128xf32> -> vector<8x128xf32>
    %165 = arith.addf %162, %164 : vector<8x128xf32>
    %166 = vector.extract_strided_slice %165 {offsets = [0, 0], sizes = [8, 96], strides = [1, 1]} : vector<8x128xf32> to vector<8x96xf32>
    %167 = arith.negf %166 : vector<8x96xf32>
    %168 = math.exp %167 : vector<8x96xf32>
    %cst_47 = arith.constant 1.000000e+00 : f32
    %169 = vector.broadcast %cst_47 : f32 to vector<8x96xf32>
    %170 = arith.addf %169, %168 : vector<8x96xf32>
    %171 = arith.divf %169, %170 : vector<8x96xf32>
    %172 = vector.extract_strided_slice %171 {offsets = [0, 0], sizes = [8, 32], strides = [1, 1]} : vector<8x96xf32> to vector<8x32xf32>
    %173 = vector.extract_strided_slice %171 {offsets = [0, 32], sizes = [8, 32], strides = [1, 1]} : vector<8x96xf32> to vector<8x32xf32>
    %174 = vector.extract_strided_slice %171 {offsets = [0, 64], sizes = [8, 32], strides = [1, 1]} : vector<8x96xf32> to vector<8x32xf32>
    %175 = vector.extract_strided_slice %165 {offsets = [0, 96], sizes = [8, 32], strides = [1, 1]} : vector<8x128xf32> to vector<8x32xf32>
    %176 = math.tanh %175 : vector<8x32xf32>
    %177 = arith.mulf %173, %129 : vector<8x32xf32>
    %178 = arith.mulf %172, %176 : vector<8x32xf32>
    %179 = arith.addf %177, %178 : vector<8x32xf32>
    %180 = math.tanh %179 : vector<8x32xf32>
    %181 = arith.mulf %174, %180 : vector<8x32xf32>
    %182 = arith.index_cast %138 : i32 to index
    %c0_48 = arith.constant 0 : index
    %183 = vector.load %arg11[%182, %c0_48] : memref<64x32xf32, #tpu.memory_space<vmem>>, vector<8x32xf32>
    tpu.vector_store %arg11[%182, %c0_48], %181 {strides = array<i32>} : memref<64x32xf32, #tpu.memory_space<vmem>>, vector<8x32xf32>,
    %c4_i32 = arith.constant 4 : i32
    %c8_i32_49 = arith.constant 8 : i32
    %184 = arith.muli %c4_i32, %c8_i32_49 : i32
    %185 = tpu.assume_multiple %184, 8 : i32
    %c1_i32_50 = arith.constant 1 : i32
    %186 = arith.subi %c4_i32, %c1_i32_50 : i32
    %c8_i32_51 = arith.constant 8 : i32
    %187 = arith.muli %186, %c8_i32_51 : i32
    %188 = tpu.assume_multiple %187, 8 : i32
    %189 = arith.index_cast %185 : i32 to index
    %c0_52 = arith.constant 0 : index
    %190 = vector.load %arg10[%189, %c0_52] : memref<64x128xf32, #tpu.memory_space<vmem>>, vector<8x128xf32>
    %191 = arith.truncf %159 : vector<8x32xf32> to vector<8x32xbf16>
    %cst_53 = arith.constant dense<0.000000e+00> : vector<8x128xf32>
    %192 = tpu.matmul %191, %0, %cst_53 {dimension_numbers = #tpu.dot_dimension_numbers<[1], [0], [0], [1], [0, 0, 1, 1], [], []>} : vector<8x32xbf16>, vector<32x128xbf16>, vector<8x128xf32> -> vector<8x128xf32>
    %193 = arith.addf %190, %192 : vector<8x128xf32>
    %194 = vector.extract_strided_slice %193 {offsets = [0, 0], sizes = [8, 96], strides = [1, 1]} : vector<8x128xf32> to vector<8x96xf32>
    %195 = arith.negf %194 : vector<8x96xf32>
    %196 = math.exp %195 : vector<8x96xf32>
    %cst_54 = arith.constant 1.000000e+00 : f32
    %197 = vector.broadcast %cst_54 : f32 to vector<8x96xf32>
    %198 = arith.addf %197, %196 : vector<8x96xf32>
    %199 = arith.divf %197, %198 : vector<8x96xf32>
    %200 = vector.extract_strided_slice %199 {offsets = [0, 0], sizes = [8, 32], strides = [1, 1]} : vector<8x96xf32> to vector<8x32xf32>
    %201 = vector.extract_strided_slice %199 {offsets = [0, 32], sizes = [8, 32], strides = [1, 1]} : vector<8x96xf32> to vector<8x32xf32>
    %202 = vector.extract_strided_slice %199 {offsets = [0, 64], sizes = [8, 32], strides = [1, 1]} : vector<8x96xf32> to vector<8x32xf32>
    %203 = vector.extract_strided_slice %193 {offsets = [0, 96], sizes = [8, 32], strides = [1, 1]} : vector<8x128xf32> to vector<8x32xf32>
    %204 = math.tanh %203 : vector<8x32xf32>
    %205 = arith.mulf %201, %157 : vector<8x32xf32>
    %206 = arith.mulf %200, %204 : vector<8x32xf32>
    %207 = arith.addf %205, %206 : vector<8x32xf32>
    %208 = math.tanh %207 : vector<8x32xf32>
    %209 = arith.mulf %202, %208 : vector<8x32xf32>
    %210 = arith.truncf %159 : vector<8x32xf32> to vector<8x32xbf16>
    %cst_55 = arith.constant dense<0.000000e+00> : vector<8x128xf32>
    %211 = tpu.matmul %210, %1, %cst_55 {dimension_numbers = #tpu.dot_dimension_numbers<[1], [0], [0], [1], [0, 0, 1, 1], [], []>} : vector<8x32xbf16>, vector<32x128xbf16>, vector<8x128xf32> -> vector<8x128xf32>
    %212 = arith.addf %5, %211 : vector<8x128xf32>
    %213 = arith.truncf %181 : vector<8x32xf32> to vector<8x32xbf16>
    %cst_56 = arith.constant dense<0.000000e+00> : vector<8x128xf32>
    %214 = tpu.matmul %213, %2, %cst_56 {dimension_numbers = #tpu.dot_dimension_numbers<[1], [0], [0], [1], [0, 0, 1, 1], [], []>} : vector<8x32xbf16>, vector<32x128xbf16>, vector<8x128xf32> -> vector<8x128xf32>
    %215 = arith.addf %212, %214 : vector<8x128xf32>
    %216 = vector.extract_strided_slice %215 {offsets = [0, 0], sizes = [8, 96], strides = [1, 1]} : vector<8x128xf32> to vector<8x96xf32>
    %217 = arith.negf %216 : vector<8x96xf32>
    %218 = math.exp %217 : vector<8x96xf32>
    %cst_57 = arith.constant 1.000000e+00 : f32
    %219 = vector.broadcast %cst_57 : f32 to vector<8x96xf32>
    %220 = arith.addf %219, %218 : vector<8x96xf32>
    %221 = arith.divf %219, %220 : vector<8x96xf32>
    %222 = vector.extract_strided_slice %221 {offsets = [0, 0], sizes = [8, 32], strides = [1, 1]} : vector<8x96xf32> to vector<8x32xf32>
    %223 = vector.extract_strided_slice %221 {offsets = [0, 32], sizes = [8, 32], strides = [1, 1]} : vector<8x96xf32> to vector<8x32xf32>
    %224 = vector.extract_strided_slice %221 {offsets = [0, 64], sizes = [8, 32], strides = [1, 1]} : vector<8x96xf32> to vector<8x32xf32>
    %225 = vector.extract_strided_slice %215 {offsets = [0, 96], sizes = [8, 32], strides = [1, 1]} : vector<8x128xf32> to vector<8x32xf32>
    %226 = math.tanh %225 : vector<8x32xf32>
    %227 = arith.mulf %223, %179 : vector<8x32xf32>
    %228 = arith.mulf %222, %226 : vector<8x32xf32>
    %229 = arith.addf %227, %228 : vector<8x32xf32>
    %230 = math.tanh %229 : vector<8x32xf32>
    %231 = arith.mulf %224, %230 : vector<8x32xf32>
    %232 = arith.index_cast %188 : i32 to index
    %c0_58 = arith.constant 0 : index
    %233 = vector.load %arg11[%232, %c0_58] : memref<64x32xf32, #tpu.memory_space<vmem>>, vector<8x32xf32>
    tpu.vector_store %arg11[%232, %c0_58], %231 {strides = array<i32>} : memref<64x32xf32, #tpu.memory_space<vmem>>, vector<8x32xf32>,
    %c5_i32 = arith.constant 5 : i32
    %c8_i32_59 = arith.constant 8 : i32
    %234 = arith.muli %c5_i32, %c8_i32_59 : i32
    %235 = tpu.assume_multiple %234, 8 : i32
    %c1_i32_60 = arith.constant 1 : i32
    %236 = arith.subi %c5_i32, %c1_i32_60 : i32
    %c8_i32_61 = arith.constant 8 : i32
    %237 = arith.muli %236, %c8_i32_61 : i32
    %238 = tpu.assume_multiple %237, 8 : i32
    %239 = arith.index_cast %235 : i32 to index
    %c0_62 = arith.constant 0 : index
    %240 = vector.load %arg10[%239, %c0_62] : memref<64x128xf32, #tpu.memory_space<vmem>>, vector<8x128xf32>
    %241 = arith.truncf %209 : vector<8x32xf32> to vector<8x32xbf16>
    %cst_63 = arith.constant dense<0.000000e+00> : vector<8x128xf32>
    %242 = tpu.matmul %241, %0, %cst_63 {dimension_numbers = #tpu.dot_dimension_numbers<[1], [0], [0], [1], [0, 0, 1, 1], [], []>} : vector<8x32xbf16>, vector<32x128xbf16>, vector<8x128xf32> -> vector<8x128xf32>
    %243 = arith.addf %240, %242 : vector<8x128xf32>
    %244 = vector.extract_strided_slice %243 {offsets = [0, 0], sizes = [8, 96], strides = [1, 1]} : vector<8x128xf32> to vector<8x96xf32>
    %245 = arith.negf %244 : vector<8x96xf32>
    %246 = math.exp %245 : vector<8x96xf32>
    %cst_64 = arith.constant 1.000000e+00 : f32
    %247 = vector.broadcast %cst_64 : f32 to vector<8x96xf32>
    %248 = arith.addf %247, %246 : vector<8x96xf32>
    %249 = arith.divf %247, %248 : vector<8x96xf32>
    %250 = vector.extract_strided_slice %249 {offsets = [0, 0], sizes = [8, 32], strides = [1, 1]} : vector<8x96xf32> to vector<8x32xf32>
    %251 = vector.extract_strided_slice %249 {offsets = [0, 32], sizes = [8, 32], strides = [1, 1]} : vector<8x96xf32> to vector<8x32xf32>
    %252 = vector.extract_strided_slice %249 {offsets = [0, 64], sizes = [8, 32], strides = [1, 1]} : vector<8x96xf32> to vector<8x32xf32>
    %253 = vector.extract_strided_slice %243 {offsets = [0, 96], sizes = [8, 32], strides = [1, 1]} : vector<8x128xf32> to vector<8x32xf32>
    %254 = math.tanh %253 : vector<8x32xf32>
    %255 = arith.mulf %251, %207 : vector<8x32xf32>
    %256 = arith.mulf %250, %254 : vector<8x32xf32>
    %257 = arith.addf %255, %256 : vector<8x32xf32>
    %258 = math.tanh %257 : vector<8x32xf32>
    %259 = arith.mulf %252, %258 : vector<8x32xf32>
    %260 = arith.truncf %209 : vector<8x32xf32> to vector<8x32xbf16>
    %cst_65 = arith.constant dense<0.000000e+00> : vector<8x128xf32>
    %261 = tpu.matmul %260, %1, %cst_65 {dimension_numbers = #tpu.dot_dimension_numbers<[1], [0], [0], [1], [0, 0, 1, 1], [], []>} : vector<8x32xbf16>, vector<32x128xbf16>, vector<8x128xf32> -> vector<8x128xf32>
    %262 = arith.addf %5, %261 : vector<8x128xf32>
    %263 = arith.truncf %231 : vector<8x32xf32> to vector<8x32xbf16>
    %cst_66 = arith.constant dense<0.000000e+00> : vector<8x128xf32>
    %264 = tpu.matmul %263, %2, %cst_66 {dimension_numbers = #tpu.dot_dimension_numbers<[1], [0], [0], [1], [0, 0, 1, 1], [], []>} : vector<8x32xbf16>, vector<32x128xbf16>, vector<8x128xf32> -> vector<8x128xf32>
    %265 = arith.addf %262, %264 : vector<8x128xf32>
    %266 = vector.extract_strided_slice %265 {offsets = [0, 0], sizes = [8, 96], strides = [1, 1]} : vector<8x128xf32> to vector<8x96xf32>
    %267 = arith.negf %266 : vector<8x96xf32>
    %268 = math.exp %267 : vector<8x96xf32>
    %cst_67 = arith.constant 1.000000e+00 : f32
    %269 = vector.broadcast %cst_67 : f32 to vector<8x96xf32>
    %270 = arith.addf %269, %268 : vector<8x96xf32>
    %271 = arith.divf %269, %270 : vector<8x96xf32>
    %272 = vector.extract_strided_slice %271 {offsets = [0, 0], sizes = [8, 32], strides = [1, 1]} : vector<8x96xf32> to vector<8x32xf32>
    %273 = vector.extract_strided_slice %271 {offsets = [0, 32], sizes = [8, 32], strides = [1, 1]} : vector<8x96xf32> to vector<8x32xf32>
    %274 = vector.extract_strided_slice %271 {offsets = [0, 64], sizes = [8, 32], strides = [1, 1]} : vector<8x96xf32> to vector<8x32xf32>
    %275 = vector.extract_strided_slice %265 {offsets = [0, 96], sizes = [8, 32], strides = [1, 1]} : vector<8x128xf32> to vector<8x32xf32>
    %276 = math.tanh %275 : vector<8x32xf32>
    %277 = arith.mulf %273, %229 : vector<8x32xf32>
    %278 = arith.mulf %272, %276 : vector<8x32xf32>
    %279 = arith.addf %277, %278 : vector<8x32xf32>
    %280 = math.tanh %279 : vector<8x32xf32>
    %281 = arith.mulf %274, %280 : vector<8x32xf32>
    %282 = arith.index_cast %238 : i32 to index
    %c0_68 = arith.constant 0 : index
    %283 = vector.load %arg11[%282, %c0_68] : memref<64x32xf32, #tpu.memory_space<vmem>>, vector<8x32xf32>
    tpu.vector_store %arg11[%282, %c0_68], %281 {strides = array<i32>} : memref<64x32xf32, #tpu.memory_space<vmem>>, vector<8x32xf32>,
    %c6_i32 = arith.constant 6 : i32
    %c8_i32_69 = arith.constant 8 : i32
    %284 = arith.muli %c6_i32, %c8_i32_69 : i32
    %285 = tpu.assume_multiple %284, 8 : i32
    %c1_i32_70 = arith.constant 1 : i32
    %286 = arith.subi %c6_i32, %c1_i32_70 : i32
    %c8_i32_71 = arith.constant 8 : i32
    %287 = arith.muli %286, %c8_i32_71 : i32
    %288 = tpu.assume_multiple %287, 8 : i32
    %289 = arith.index_cast %285 : i32 to index
    %c0_72 = arith.constant 0 : index
    %290 = vector.load %arg10[%289, %c0_72] : memref<64x128xf32, #tpu.memory_space<vmem>>, vector<8x128xf32>
    %291 = arith.truncf %259 : vector<8x32xf32> to vector<8x32xbf16>
    %cst_73 = arith.constant dense<0.000000e+00> : vector<8x128xf32>
    %292 = tpu.matmul %291, %0, %cst_73 {dimension_numbers = #tpu.dot_dimension_numbers<[1], [0], [0], [1], [0, 0, 1, 1], [], []>} : vector<8x32xbf16>, vector<32x128xbf16>, vector<8x128xf32> -> vector<8x128xf32>
    %293 = arith.addf %290, %292 : vector<8x128xf32>
    %294 = vector.extract_strided_slice %293 {offsets = [0, 0], sizes = [8, 96], strides = [1, 1]} : vector<8x128xf32> to vector<8x96xf32>
    %295 = arith.negf %294 : vector<8x96xf32>
    %296 = math.exp %295 : vector<8x96xf32>
    %cst_74 = arith.constant 1.000000e+00 : f32
    %297 = vector.broadcast %cst_74 : f32 to vector<8x96xf32>
    %298 = arith.addf %297, %296 : vector<8x96xf32>
    %299 = arith.divf %297, %298 : vector<8x96xf32>
    %300 = vector.extract_strided_slice %299 {offsets = [0, 0], sizes = [8, 32], strides = [1, 1]} : vector<8x96xf32> to vector<8x32xf32>
    %301 = vector.extract_strided_slice %299 {offsets = [0, 32], sizes = [8, 32], strides = [1, 1]} : vector<8x96xf32> to vector<8x32xf32>
    %302 = vector.extract_strided_slice %299 {offsets = [0, 64], sizes = [8, 32], strides = [1, 1]} : vector<8x96xf32> to vector<8x32xf32>
    %303 = vector.extract_strided_slice %293 {offsets = [0, 96], sizes = [8, 32], strides = [1, 1]} : vector<8x128xf32> to vector<8x32xf32>
    %304 = math.tanh %303 : vector<8x32xf32>
    %305 = arith.mulf %301, %257 : vector<8x32xf32>
    %306 = arith.mulf %300, %304 : vector<8x32xf32>
    %307 = arith.addf %305, %306 : vector<8x32xf32>
    %308 = math.tanh %307 : vector<8x32xf32>
    %309 = arith.mulf %302, %308 : vector<8x32xf32>
    %310 = arith.truncf %259 : vector<8x32xf32> to vector<8x32xbf16>
    %cst_75 = arith.constant dense<0.000000e+00> : vector<8x128xf32>
    %311 = tpu.matmul %310, %1, %cst_75 {dimension_numbers = #tpu.dot_dimension_numbers<[1], [0], [0], [1], [0, 0, 1, 1], [], []>} : vector<8x32xbf16>, vector<32x128xbf16>, vector<8x128xf32> -> vector<8x128xf32>
    %312 = arith.addf %5, %311 : vector<8x128xf32>
    %313 = arith.truncf %281 : vector<8x32xf32> to vector<8x32xbf16>
    %cst_76 = arith.constant dense<0.000000e+00> : vector<8x128xf32>
    %314 = tpu.matmul %313, %2, %cst_76 {dimension_numbers = #tpu.dot_dimension_numbers<[1], [0], [0], [1], [0, 0, 1, 1], [], []>} : vector<8x32xbf16>, vector<32x128xbf16>, vector<8x128xf32> -> vector<8x128xf32>
    %315 = arith.addf %312, %314 : vector<8x128xf32>
    %316 = vector.extract_strided_slice %315 {offsets = [0, 0], sizes = [8, 96], strides = [1, 1]} : vector<8x128xf32> to vector<8x96xf32>
    %317 = arith.negf %316 : vector<8x96xf32>
    %318 = math.exp %317 : vector<8x96xf32>
    %cst_77 = arith.constant 1.000000e+00 : f32
    %319 = vector.broadcast %cst_77 : f32 to vector<8x96xf32>
    %320 = arith.addf %319, %318 : vector<8x96xf32>
    %321 = arith.divf %319, %320 : vector<8x96xf32>
    %322 = vector.extract_strided_slice %321 {offsets = [0, 0], sizes = [8, 32], strides = [1, 1]} : vector<8x96xf32> to vector<8x32xf32>
    %323 = vector.extract_strided_slice %321 {offsets = [0, 32], sizes = [8, 32], strides = [1, 1]} : vector<8x96xf32> to vector<8x32xf32>
    %324 = vector.extract_strided_slice %321 {offsets = [0, 64], sizes = [8, 32], strides = [1, 1]} : vector<8x96xf32> to vector<8x32xf32>
    %325 = vector.extract_strided_slice %315 {offsets = [0, 96], sizes = [8, 32], strides = [1, 1]} : vector<8x128xf32> to vector<8x32xf32>
    %326 = math.tanh %325 : vector<8x32xf32>
    %327 = arith.mulf %323, %279 : vector<8x32xf32>
    %328 = arith.mulf %322, %326 : vector<8x32xf32>
    %329 = arith.addf %327, %328 : vector<8x32xf32>
    %330 = math.tanh %329 : vector<8x32xf32>
    %331 = arith.mulf %324, %330 : vector<8x32xf32>
    %332 = arith.index_cast %288 : i32 to index
    %c0_78 = arith.constant 0 : index
    %333 = vector.load %arg11[%332, %c0_78] : memref<64x32xf32, #tpu.memory_space<vmem>>, vector<8x32xf32>
    tpu.vector_store %arg11[%332, %c0_78], %331 {strides = array<i32>} : memref<64x32xf32, #tpu.memory_space<vmem>>, vector<8x32xf32>,
    %c7_i32 = arith.constant 7 : i32
    %c8_i32_79 = arith.constant 8 : i32
    %334 = arith.muli %c7_i32, %c8_i32_79 : i32
    %335 = tpu.assume_multiple %334, 8 : i32
    %c1_i32_80 = arith.constant 1 : i32
    %336 = arith.subi %c7_i32, %c1_i32_80 : i32
    %c8_i32_81 = arith.constant 8 : i32
    %337 = arith.muli %336, %c8_i32_81 : i32
    %338 = tpu.assume_multiple %337, 8 : i32
    %339 = arith.index_cast %335 : i32 to index
    %c0_82 = arith.constant 0 : index
    %340 = vector.load %arg10[%339, %c0_82] : memref<64x128xf32, #tpu.memory_space<vmem>>, vector<8x128xf32>
    %341 = arith.truncf %309 : vector<8x32xf32> to vector<8x32xbf16>
    %cst_83 = arith.constant dense<0.000000e+00> : vector<8x128xf32>
    %342 = tpu.matmul %341, %0, %cst_83 {dimension_numbers = #tpu.dot_dimension_numbers<[1], [0], [0], [1], [0, 0, 1, 1], [], []>} : vector<8x32xbf16>, vector<32x128xbf16>, vector<8x128xf32> -> vector<8x128xf32>
    %343 = arith.addf %340, %342 : vector<8x128xf32>
    %344 = vector.extract_strided_slice %343 {offsets = [0, 0], sizes = [8, 96], strides = [1, 1]} : vector<8x128xf32> to vector<8x96xf32>
    %345 = arith.negf %344 : vector<8x96xf32>
    %346 = math.exp %345 : vector<8x96xf32>
    %cst_84 = arith.constant 1.000000e+00 : f32
    %347 = vector.broadcast %cst_84 : f32 to vector<8x96xf32>
    %348 = arith.addf %347, %346 : vector<8x96xf32>
    %349 = arith.divf %347, %348 : vector<8x96xf32>
    %350 = vector.extract_strided_slice %349 {offsets = [0, 0], sizes = [8, 32], strides = [1, 1]} : vector<8x96xf32> to vector<8x32xf32>
    %351 = vector.extract_strided_slice %349 {offsets = [0, 32], sizes = [8, 32], strides = [1, 1]} : vector<8x96xf32> to vector<8x32xf32>
    %352 = vector.extract_strided_slice %349 {offsets = [0, 64], sizes = [8, 32], strides = [1, 1]} : vector<8x96xf32> to vector<8x32xf32>
    %353 = vector.extract_strided_slice %343 {offsets = [0, 96], sizes = [8, 32], strides = [1, 1]} : vector<8x128xf32> to vector<8x32xf32>
    %354 = math.tanh %353 : vector<8x32xf32>
    %355 = arith.mulf %351, %307 : vector<8x32xf32>
    %356 = arith.mulf %350, %354 : vector<8x32xf32>
    %357 = arith.addf %355, %356 : vector<8x32xf32>
    %358 = math.tanh %357 : vector<8x32xf32>
    %359 = arith.mulf %352, %358 : vector<8x32xf32>
    %360 = arith.truncf %309 : vector<8x32xf32> to vector<8x32xbf16>
    %cst_85 = arith.constant dense<0.000000e+00> : vector<8x128xf32>
    %361 = tpu.matmul %360, %1, %cst_85 {dimension_numbers = #tpu.dot_dimension_numbers<[1], [0], [0], [1], [0, 0, 1, 1], [], []>} : vector<8x32xbf16>, vector<32x128xbf16>, vector<8x128xf32> -> vector<8x128xf32>
    %362 = arith.addf %5, %361 : vector<8x128xf32>
    %363 = arith.truncf %331 : vector<8x32xf32> to vector<8x32xbf16>
    %cst_86 = arith.constant dense<0.000000e+00> : vector<8x128xf32>
    %364 = tpu.matmul %363, %2, %cst_86 {dimension_numbers = #tpu.dot_dimension_numbers<[1], [0], [0], [1], [0, 0, 1, 1], [], []>} : vector<8x32xbf16>, vector<32x128xbf16>, vector<8x128xf32> -> vector<8x128xf32>
    %365 = arith.addf %362, %364 : vector<8x128xf32>
    %366 = vector.extract_strided_slice %365 {offsets = [0, 0], sizes = [8, 96], strides = [1, 1]} : vector<8x128xf32> to vector<8x96xf32>
    %367 = arith.negf %366 : vector<8x96xf32>
    %368 = math.exp %367 : vector<8x96xf32>
    %cst_87 = arith.constant 1.000000e+00 : f32
    %369 = vector.broadcast %cst_87 : f32 to vector<8x96xf32>
    %370 = arith.addf %369, %368 : vector<8x96xf32>
    %371 = arith.divf %369, %370 : vector<8x96xf32>
    %372 = vector.extract_strided_slice %371 {offsets = [0, 0], sizes = [8, 32], strides = [1, 1]} : vector<8x96xf32> to vector<8x32xf32>
    %373 = vector.extract_strided_slice %371 {offsets = [0, 32], sizes = [8, 32], strides = [1, 1]} : vector<8x96xf32> to vector<8x32xf32>
    %374 = vector.extract_strided_slice %371 {offsets = [0, 64], sizes = [8, 32], strides = [1, 1]} : vector<8x96xf32> to vector<8x32xf32>
    %375 = vector.extract_strided_slice %365 {offsets = [0, 96], sizes = [8, 32], strides = [1, 1]} : vector<8x128xf32> to vector<8x32xf32>
    %376 = math.tanh %375 : vector<8x32xf32>
    %377 = arith.mulf %373, %329 : vector<8x32xf32>
    %378 = arith.mulf %372, %376 : vector<8x32xf32>
    %379 = arith.addf %377, %378 : vector<8x32xf32>
    %380 = math.tanh %379 : vector<8x32xf32>
    %381 = arith.mulf %374, %380 : vector<8x32xf32>
    %382 = arith.index_cast %338 : i32 to index
    %c0_88 = arith.constant 0 : index
    %383 = vector.load %arg11[%382, %c0_88] : memref<64x32xf32, #tpu.memory_space<vmem>>, vector<8x32xf32>
    tpu.vector_store %arg11[%382, %c0_88], %381 {strides = array<i32>} : memref<64x32xf32, #tpu.memory_space<vmem>>, vector<8x32xf32>,
    %c7_i32_89 = arith.constant 7 : i32
    %384 = arith.truncf %359 : vector<8x32xf32> to vector<8x32xbf16>
    %cst_90 = arith.constant dense<0.000000e+00> : vector<8x128xf32>
    %385 = tpu.matmul %384, %1, %cst_90 {dimension_numbers = #tpu.dot_dimension_numbers<[1], [0], [0], [1], [0, 0, 1, 1], [], []>} : vector<8x32xbf16>, vector<32x128xbf16>, vector<8x128xf32> -> vector<8x128xf32>
    %386 = arith.addf %5, %385 : vector<8x128xf32>
    %387 = arith.truncf %381 : vector<8x32xf32> to vector<8x32xbf16>
    %cst_91 = arith.constant dense<0.000000e+00> : vector<8x128xf32>
    %388 = tpu.matmul %387, %2, %cst_91 {dimension_numbers = #tpu.dot_dimension_numbers<[1], [0], [0], [1], [0, 0, 1, 1], [], []>} : vector<8x32xbf16>, vector<32x128xbf16>, vector<8x128xf32> -> vector<8x128xf32>
    %389 = arith.addf %386, %388 : vector<8x128xf32>
    %390 = vector.extract_strided_slice %389 {offsets = [0, 0], sizes = [8, 96], strides = [1, 1]} : vector<8x128xf32> to vector<8x96xf32>
    %391 = arith.negf %390 : vector<8x96xf32>
    %392 = math.exp %391 : vector<8x96xf32>
    %cst_92 = arith.constant 1.000000e+00 : f32
    %393 = vector.broadcast %cst_92 : f32 to vector<8x96xf32>
    %394 = arith.addf %393, %392 : vector<8x96xf32>
    %395 = arith.divf %393, %394 : vector<8x96xf32>
    %396 = vector.extract_strided_slice %395 {offsets = [0, 0], sizes = [8, 32], strides = [1, 1]} : vector<8x96xf32> to vector<8x32xf32>
    %397 = vector.extract_strided_slice %395 {offsets = [0, 32], sizes = [8, 32], strides = [1, 1]} : vector<8x96xf32> to vector<8x32xf32>
    %398 = vector.extract_strided_slice %395 {offsets = [0, 64], sizes = [8, 32], strides = [1, 1]} : vector<8x96xf32> to vector<8x32xf32>
    %399 = vector.extract_strided_slice %389 {offsets = [0, 96], sizes = [8, 32], strides = [1, 1]} : vector<8x128xf32> to vector<8x32xf32>
    %400 = math.tanh %399 : vector<8x32xf32>
    %401 = arith.mulf %397, %379 : vector<8x32xf32>
    %402 = arith.mulf %396, %400 : vector<8x32xf32>
    %403 = arith.addf %401, %402 : vector<8x32xf32>
    %404 = math.tanh %403 : vector<8x32xf32>
    %405 = arith.mulf %398, %404 : vector<8x32xf32>
    %c56 = arith.constant 56 : index
    %c0_93 = arith.constant 0 : index
    %406 = vector.load %arg11[%c56, %c0_93] : memref<64x32xf32, #tpu.memory_space<vmem>>, vector<8x32xf32>
    tpu.vector_store %arg11[%c56, %c0_93], %405 {strides = array<i32>} : memref<64x32xf32, #tpu.memory_space<vmem>>, vector<8x32xf32>,
    %c0_94 = arith.constant 0 : index
    %c0_95 = arith.constant 0 : index
    %407 = vector.load %arg11[%c0_94, %c0_95] : memref<64x32xf32, #tpu.memory_space<vmem>>, vector<64x32xf32>
    %408 = arith.truncf %407 : vector<64x32xf32> to vector<64x32xbf16>
    %c0_96 = arith.constant 0 : index
    %c0_97 = arith.constant 0 : index
    %409 = vector.load %arg7[%c0_96, %c0_97] : memref<32x128xbf16, #tpu.memory_space<vmem>>, vector<32x128xbf16>
    %cst_98 = arith.constant dense<0.000000e+00> : vector<64x128xf32>
    %410 = tpu.matmul %408, %409, %cst_98 {dimension_numbers = #tpu.dot_dimension_numbers<[1], [0], [0], [1], [0, 0, 1, 1], [], []>} : vector<64x32xbf16>, vector<32x128xbf16>, vector<64x128xf32> -> vector<64x128xf32>
    %c0_99 = arith.constant 0 : index
    %c0_100 = arith.constant 0 : index
    %411 = vector.load %arg8[%c0_99, %c0_100] : memref<1x128xf32, #tpu.memory_space<vmem>>, vector<1x128xf32>
    %412 = vector.broadcast %411 : vector<1x128xf32> to vector<64x128xf32>
    %413 = arith.addf %410, %412 : vector<64x128xf32>
    %c0_101 = arith.constant 0 : index
    %c0_102 = arith.constant 0 : index
    %414 = vector.load %arg9[%c0_101, %c0_102] : memref<64x128xf32, #tpu.memory_space<vmem>>, vector<64x128xf32>
    tpu.vector_store %arg9[%c0_101, %c0_102], %413 {strides = array<i32>} : memref<64x128xf32, #tpu.memory_space<vmem>>, vector<64x128xf32>,
    return
  }
}

</mosaic_0001>

<bundles_post_ra>
// kernel: hypernym_hyponym_lstm_forward.1
= control target key start
LH: loop header
LB: loop body
LE: loop exit
PB: predicated region body
PF: predicated region fallthrough
CT: control target
= control target key end

     0   :  { %vm103_vm0 = vcmask 261120   ;;  %v2442_v7 = vmov 0.0   ;;  %vm2443_vm1 = vmmov 0   ;;  %v2444_v9 = vmov 0   ;;  %s2446_s28 = smov 64   ;;  %s2953_s1 = inlined_call_operand.vmem [shape: bf16[32,128], index: 1, kind: input, shape index: {}]   ;;  %s2954_s0 = inlined_call_operand.vmem [shape: bf16[64,32], index: 0, kind: input, shape index: {}]   ;;  %s2955_s2 = inlined_call_operand.vmem [shape: bf16[32,128], index: 2, kind: input, shape index: {}]   ;;  %s2956_s3 = inlined_call_operand.vmem [shape: f32[1,128], index: 3, kind: input, shape index: {}]   ;;  %s2957_s4 = inlined_call_operand.vmem [shape: bf16[32,128], index: 4, kind: input, shape index: {}]   ;;  %s2958_s5 = inlined_call_operand.vmem [shape: bf16[32,128], index: 5, kind: input, shape index: {}]   ;;  %s2959_s6 = inlined_call_operand.vmem [shape: f32[1,128], index: 6, kind: input, shape index: {}]   ;;  %s2960_s7 = inlined_call_operand.vmem [shape: bf16[32,128], index: 7, kind: input, shape index: {}]   ;;  %s2961_s8 = inlined_call_operand.vmem [shape: f32[1,128], index: 8, kind: input, shape index: {}]   ;;  %s2962_s9 = inlined_call_operand.vmem [shape: f32[64,128], index: 9, kind: output, shape index: {}]  }
   0x1   :  { %v2298_v0 = vld [vmem:[%s2953_s1] sm:$0xff]   ;;  %v2299_v1 = vld [vmem:[%s2953_s1 + $0x8] sm:$0xff]   ;;  %v2300_v2 = vld [vmem:[%s2954_s0 + $0x10] sm:$0xff]  }
   0x2   :  { %2249 = vmatprep.subr.bf16.mxu1 %v2298_v0  ;;  %2033 = vmatprep.subr.bf16.mxu0 %v2298_v0  ;;  %v2301_v3 = vld [vmem:[%s2954_s0 + $0x18] sm:$0xff]   ;;  %v2303_v4 = vld [vmem:[%s2954_s0] sm:$0xff]   ;;  %v2304_v5 = vld [vmem:[%s2954_s0 + $0x8] sm:$0xff]  }
   0x3   :  { %2251 = vmatpush3.bf16.msra.mxu1 %v2298_v0  ;;  %2034 = vmatpush3.bf16.msra.mxu0 %v2298_v0  ;;  %v2519_v6 = vld [vmem:[%s2955_s2] sm:$0xff]   ;;  %v2530_v8 = vld [vmem:[%s2955_s2 + $0x8] sm:$0xff]  }
   0x4   :  { %2250 = vmatprep.subr.bf16.mxu1 %v2299_v1  ;;  %2035 = vmatprep.subr.bf16.mxu0 %v2299_v1  ;;  %v1887_v10 = vld [vmem:[%s2956_s3] ss:$0 sm:$0xff]  ;;  %s2445_s3 = smov 32   ;;  %v2575_v43 = vld [vmem:[%s2957_s4 + $0x8] sm:$0xff]  }
   0x5   :  { %2041 = vmatprep.mubr.msk.bf16.mxu1 %vm103_vm0, %v2300_v2  ;;  %2037 = vmatprep.mubr.msk.bf16.mxu0 %vm103_vm0, %v2303_v4  ;;  %v2569_v42 = vld [vmem:[%s2957_s4] sm:$0xff]   ;;  %v2593_v50 = vld [vmem:[%s2958_s5 + $0x8] sm:$0xff]  }
   0x6   :  { %v2585_v48 = vld [vmem:[%s2958_s5] sm:$0xff]  }
   0x7   :  { %2252 = vmatpush3.bf16.msra.mxu1 %v2299_v1  ;;  %2036 = vmatpush3.bf16.msra.mxu0 %v2299_v1  ;;  %v2616_v56 = vld [vmem:[%s2959_s6] ss:$0 sm:$0xff] }
   0x8   :  { %2045 = vmatprep.subr.bf16.mxu1 %v2442_v7  ;;  %2061 = vmatprep.subr.bf16.mxu0 %v2442_v7 }
   0xa   :  { %2042 = vmatmul.mubr.msk.bf16.vlgmr.msra.gmra.mrb[0].mxu1 %vm103_vm0, %v2301_v3  ;;  %2038 = vmatmul.mubr.msk.bf16.vlgmr.msra.gmra.mrb[0].mxu0 %vm103_vm0, %v2304_v5 }
   0xb   :  { %2046 = vmatpush3.bf16.msra.mxu1 %v2519_v6  ;;  %2049 = vmatprep.mubr.msk.bf16.mxu1 %vm2443_vm1, %v2442_v7 }
   0xc   :  { %2047 = vmatprep.subr.bf16.mxu1 %v2442_v7  ;;  %2065 = vmatprep.mubr.msk.bf16.mxu0 %vm2443_vm1, %v2442_v7 }
   0xd   :  { %2062 = vmatpush3.bf16.msra.mxu0 %v2569_v42 }
   0xe   :  { %2063 = vmatprep.subr.bf16.mxu0 %v2442_v7 }
   0xf   :  { %2048 = vmatpush3.bf16.msra.mxu1 %v2530_v8 }
  0x10   :  { %2053 = vmatprep.subr.bf16.mxu1 %v2442_v7 }
  0x11   :  { %2064 = vmatpush3.bf16.msra.mxu0 %v2575_v43 }
  0x12   :  { %2050 = vmatmul.mubr.bf16.vlgmr.msra.gmra.mrb[4].mxu1 %v2444_v9  ;;  %2069 = vmatprep.subr.bf16.mxu0 %v2442_v7 }
  0x13   :  { %2054 = vmatpush3.bf16.msra.mxu1 %v2519_v6  ;;  %2057 = vmatprep.mubr.msk.bf16.mxu1 %vm2443_vm1, %v2442_v7 }
  0x14   :  { %2055 = vmatprep.subr.bf16.mxu1 %v2442_v7 }
  0x17   :  { %2056 = vmatpush3.bf16.msra.mxu1 %v2530_v8 }
  0x18   :  { %2077 = vmatprep.subr.bf16.mxu1 %v2442_v7 }
  0xdd   :  { %v2043_v11 = vpop.f32.mrb[0].mxu1  ;;  %v2039_v12 = vpop.f32.mrb[0].mxu0 }
  0xde   :  { %v2549_v13 = vadd.f32 %v2043_v11, %v1887_v10  ;;  %v166_v14 = vpop.f32.mrb[1].mxu1  ;;  %v2551_v15 = vadd.f32 %v2039_v12, %v1887_v10  ;;  %v150_v16 = vpop.f32.mrb[1].mxu0 }
  0xdf   :  { %v2553_v17 = vadd.f32 %v1887_v10, %v166_v14  ;;  %v2044_v18 = vpop.f32.mrb[2].mxu1  ;;  %v2040_v19 = vpop.f32.mrb[2].mxu0  ;;  %v151_v26 = vadd.f32 %v1887_v10, %v150_v16 }
  0xe0   :  { %v2555_v20 = vadd.f32 %v2044_v18, %v1887_v10  ;;  %v169_v21 = vpop.f32.mrb[3].mxu1  ;;  %v2557_v22 = vadd.f32 %v2040_v19, %v1887_v10  ;;  %v153_v23 = vpop.f32.mrb[3].mxu0 }
  0xe1   :  { %v2559_v24 = vadd.f32 %v1887_v10, %v169_v21  ;;  %v154_v25 = vadd.f32 %v1887_v10, %v153_v23 }
  0xe5   :  { %v239_v27 = vpop.f32.mrb[4].mxu1 }
  0xe6   :  { %v245_v28 = vadd.f32 %v239_v27, %v151_v26  ;;  %v2051_v29 = vpop.f32.mrb[5].mxu1 }
  0xe7   :  { %v242_v30 = vpop.f32.mrb[6].mxu1 }
  0xe8   :  { %2312 = vtanh.f32 %v245_v28  ;;  %v2052_v31 = vpop.f32.mrb[7].mxu1  ;;  %v1900_v33 = vmul.f32 -1.442695, %v245_v28 }
  0xea   :  { %2314 = vpow2.f32 %v1900_v33 }
  0xf2   :  { %v2313_v32 = vpop.eup %2312 }
  0xf3   :  { %255 = vrot.lane.b32.xlu0 %v2313_v32, %s2445_s3 }
  0xf4   :  { %v2315_v34 = vpop.eup %2314 }
  0xf5   :  { %v249_v35 = vadd.f32 1.0, %v2315_v34 }
  0xf7   :  { %2316 = vrcp.f32 %v249_v35 }
 0x101   :  { %v2317_v36 = vpop.eup %2316 }
 0x102   :  { %v253_v39 = vmul.f32 0.0, %v2317_v36 }
 0x165   :  { %v256_v37 = vpop.permute.xlu0 %255 }
 0x166   :  { %v258_v38 = vmul.f32 %v2317_v36, %v256_v37 }
 0x168   :  { %260 = vrot.lane.b32.xlu0 %v258_v38, %s2445_s3 }
 0x1da   :  { %v261_v40 = vpop.permute.xlu0 %260 }
 0x1db   :  { %v2563_v41 = vadd.f32 %v261_v40, %v253_v39 }
 0x1dd   :  { %2318 = vtanh.f32 %v2563_v41 }
 0x1e7   :  { %v2319_v44 = vpop.eup %2318 }
 0x1e8   :  { %266 = vrot.lane.b32.xlu1 %v2319_v44, %s2445_s3 }
 0x25a   :  { %v267_v45 = vpop.permute.xlu1 %266 }
 0x25b   :  { %v269_v46 = vmul.f32 %v2317_v36, %v267_v45 }
 0x25d   :  { %v272_v47 = vpack.c.bf16 %v269_v46, %v269_v46 }
 0x25f   :  { %274 = vrot.lane.b32.xlu1 %v272_v47, %s2446_s28 }
 0x2d1   :  { %v275_v49 = vpop.permute.xlu1 %274 }
 0x2d2   :  { %2058 = vmatmul.mubr.msk.bf16.vlgmr.msra.gmra.mrb[8].mxu1 %vm103_vm0, %v275_v49  ;;  %2066 = vmatmul.mubr.msk.bf16.vlgmr.msra.gmra.mrb[4].mxu0 %vm103_vm0, %v275_v49 }
 0x2d3   :  { %2070 = vmatpush3.bf16.msra.mxu0 %v2585_v48  ;;  %2073 = vmatprep.mubr.msk.bf16.mxu0 %vm2443_vm1, %v2442_v7 }
 0x2d4   :  { %2071 = vmatprep.subr.bf16.mxu0 %v2442_v7  ;;  %2078 = vmatpush3.bf16.msra.mxu1 %v2519_v6 }
 0x2d5   :  { %2079 = vmatprep.subr.bf16.mxu1 %v2442_v7  ;;  %2081 = vmatprep.mubr.msk.bf16.mxu1 %vm2443_vm1, %v2442_v7 }
 0x2d7   :  { %2072 = vmatpush3.bf16.msra.mxu0 %v2593_v50 }
 0x2d8   :  { %2080 = vmatpush3.bf16.msra.mxu1 %v2530_v8  ;;  %2101 = vmatprep.subr.bf16.mxu0 %v2442_v7 }
 0x2d9   :  { %2085 = vmatprep.subr.bf16.mxu1 %v2442_v7 }
 0x2de   :  { %2074 = vmatmul.mubr.bf16.vlgmr.msra.gmra.mrb[4].mxu0 %v2444_v9 }
 0x2df   :  { %2102 = vmatpush3.bf16.msra.mxu0 %v2519_v6  ;;  %2105 = vmatprep.mubr.msk.bf16.mxu0 %vm2443_vm1, %v2442_v7 }
 0x2e0   :  { %2103 = vmatprep.subr.bf16.mxu0 %v2442_v7 }
 0x2e3   :  { %2104 = vmatpush3.bf16.msra.mxu0 %v2530_v8 }
 0x2e4   :  { %2109 = vmatprep.subr.bf16.mxu0 %v2442_v7 }
 0x3a5   :  { %v313_v51 = vpop.f32.mrb[8].mxu1 }
 0x3a6   :  { %v319_v52 = vadd.f32 %v313_v51, %v154_v25  ;;  %v2059_v53 = vpop.f32.mrb[9].mxu1 }
 0x3a7   :  { %v316_v54 = vpop.f32.mrb[10].mxu1 }
 0x3a8   :  { %2320 = vtanh.f32 %v319_v52  ;;  %v2060_v55 = vpop.f32.mrb[11].mxu1  ;;  %v1902_v0 = vmul.f32 -1.442695, %v319_v52 }
 0x3b1   :  { %v443_v57 = vpop.f32.mrb[4].mxu0 }
 0x3b2   :  { %v2321_v58 = vpop.eup %2320  ;;  %v2253_v59 = vadd.f32 %v2616_v56, %v443_v57  ;;  %v2075_v60 = vpop.f32.mrb[5].mxu0 }
 0x3b3   :  { %v446_v61 = vpop.f32.mrb[6].mxu0  ;;  %329 = vrot.lane.b32.xlu0 %v2321_v58, %s2445_s3 }
 0x3b4   :  { %2322 = vtanh.f32 %v2253_v59  ;;  %v2076_v62 = vpop.f32.mrb[7].mxu0  ;;  %v1908_v1 = vmul.f32 -1.442695, %v2253_v59 }
 0x3b5   :  { %2324 = vpow2.f32 %v1902_v0 }
 0x3b6   :  { %2326 = vpow2.f32 %v1908_v1 }
 0x3be   :  { %v2323_v63 = vpop.eup %2322 }
 0x3bf   :  { %459 = vrot.lane.b32.xlu1 %v2323_v63, %s2445_s3  ;;  %v2325_v2 = vpop.eup %2324 }
 0x3c0   :  { %v323_v3 = vadd.f32 1.0, %v2325_v2  ;;  %v2327_v4 = vpop.eup %2326 }
 0x3c1   :  { %v453_v5 = vadd.f32 1.0, %v2327_v4 }
 0x3c2   :  { %2328 = vrcp.f32 %v323_v3 }
 0x3c3   :  { %2330 = vrcp.f32 %v453_v5 }
 0x3cc   :  { %v2329_v9 = vpop.eup %2328 }
 0x3cd   :  { %v2331_v12 = vpop.eup %2330  ;;  %v327_v18 = vmul.f32 %v2329_v9, %v2563_v41 }
 0x3ce   :  { %v457_v23 = vmul.f32 0.0, %v2331_v12 }
 0x425   :  { %v330_v10 = vpop.permute.xlu0 %329 }
 0x426   :  { %v332_v11 = vmul.f32 %v2329_v9, %v330_v10 }
 0x428   :  { %334 = vrot.lane.b32.xlu0 %v332_v11, %s2445_s3 }
 0x431   :  { %v460_v14 = vpop.permute.xlu1 %459 }
 0x432   :  { %v462_v16 = vmul.f32 %v2331_v12, %v460_v14 }
 0x434   :  { %464 = vrot.lane.b32.xlu1 %v462_v16, %s2445_s3 }
 0x49a   :  { %v335_v19 = vpop.permute.xlu0 %334 }
 0x49b   :  { %v2624_v21 = vadd.f32 %v335_v19, %v327_v18 }
 0x49d   :  { %2332 = vtanh.f32 %v2624_v21 }
 0x4a6   :  { %v465_v25 = vpop.permute.xlu1 %464 }
 0x4a7   :  { %v2333_v26 = vpop.eup %2332  ;;  %v2627_v27 = vadd.f32 %v465_v25, %v457_v23 }
 0x4a8   :  { %340 = vrot.lane.b32.xlu0 %v2333_v26, %s2445_s3 }
 0x4a9   :  { %2334 = vtanh.f32 %v2627_v27 }
 0x4b3   :  { %v2335_v28 = vpop.eup %2334 }
 0x4b4   :  { %470 = vrot.lane.b32.xlu1 %v2335_v28, %s2445_s3 }
 0x51a   :  { %v341_v29 = vpop.permute.xlu0 %340 }
 0x51b   :  { %v343_v30 = vmul.f32 %v2329_v9, %v341_v29 }
 0x51d   :  { %v481_v31 = vpack.c.bf16 %v343_v30, %v343_v30 }
 0x51f   :  { %483 = vrot.lane.b32.xlu0 %v481_v31, %s2446_s28 }
 0x526   :  { %v471_v32 = vpop.permute.xlu1 %470 }
 0x527   :  { %v2633_v33 = vmul.f32 %v2331_v12, %v471_v32 }
 0x529   :  { %v594_v34 = vpack.c.bf16 %v2633_v33, %v2633_v33 }
 0x52b   :  { %596 = vrot.lane.b32.xlu1 %v594_v34, %s2446_s28 }
 0x591   :  { %v484_v35 = vpop.permute.xlu0 %483 }
 0x592   :  { %2082 = vmatmul.mubr.msk.bf16.vlgmr.msra.gmra.mrb[12].mxu1 %vm103_vm0, %v484_v35 }
 0x593   :  { %2086 = vmatpush3.bf16.msra.mxu1 %v2569_v42  ;;  %2089 = vmatprep.mubr.msk.bf16.mxu1 %vm2443_vm1, %v2442_v7 }
 0x594   :  { %2087 = vmatprep.subr.bf16.mxu1 %v2442_v7 }
 0x597   :  { %2088 = vmatpush3.bf16.msra.mxu1 %v2575_v43 }
 0x598   :  { %2093 = vmatprep.subr.bf16.mxu1 %v2442_v7 }
 0x59a   :  { %2090 = vmatmul.mubr.msk.bf16.vlgmr.msra.gmra.mrb[16].mxu1 %vm103_vm0, %v484_v35 }
 0x59b   :  { %2094 = vmatpush3.bf16.msra.mxu1 %v2585_v48  ;;  %2097 = vmatprep.mubr.msk.bf16.mxu1 %vm2443_vm1, %v2442_v7 }
 0x59c   :  { %2095 = vmatprep.subr.bf16.mxu1 %v2442_v7 }
 0x59d   :  { %v597_v36 = vpop.permute.xlu1 %596 }
 0x59f   :  { %2096 = vmatpush3.bf16.msra.mxu1 %v2593_v50 }
 0x5a0   :  { %2125 = vmatprep.subr.bf16.mxu1 %v2442_v7 }
 0x5a6   :  { %2098 = vmatmul.mubr.msk.bf16.vlgmr.msra.gmra.mrb[16].mxu1 %vm103_vm0, %v597_v36 }
 0x5a7   :  { %2126 = vmatpush3.bf16.msra.mxu1 %v2519_v6  ;;  %2129 = vmatprep.mubr.msk.bf16.mxu1 %vm2443_vm1, %v2442_v7 }
 0x5a8   :  { %2127 = vmatprep.subr.bf16.mxu1 %v2442_v7 }
 0x5ab   :  { %2128 = vmatpush3.bf16.msra.mxu1 %v2530_v8 }
 0x5ac   :  { %2133 = vmatprep.subr.bf16.mxu1 %v2442_v7 }
 0x665   :  { %v522_v37 = vpop.f32.mrb[12].mxu1 }
 0x666   :  { %v528_v38 = vadd.f32 %v522_v37, %v2551_v15  ;;  %v2083_v39 = vpop.f32.mrb[13].mxu1 }
 0x667   :  { %v525_v40 = vpop.f32.mrb[14].mxu1 }
 0x668   :  { %2336 = vtanh.f32 %v528_v38  ;;  %v2084_v41 = vpop.f32.mrb[15].mxu1  ;;  %v1910_v53 = vmul.f32 -1.442695, %v528_v38 }
 0x672   :  { %v2337_v44 = vpop.eup %2336 }
 0x673   :  { %538 = vrot.lane.b32.xlu0 %v2337_v44, %s2445_s3 }
 0x679   :  { %v635_v45 = vpop.f32.mrb[16].mxu1 }
 0x67a   :  { %v2254_v46 = vadd.f32 %v2616_v56, %v635_v45  ;;  %v2099_v47 = vpop.f32.mrb[17].mxu1 }
 0x67b   :  { %v638_v49 = vpop.f32.mrb[18].mxu1 }
 0x67c   :  { %2338 = vtanh.f32 %v2254_v46  ;;  %v2100_v51 = vpop.f32.mrb[19].mxu1  ;;  %v1913_v55 = vmul.f32 -1.442695, %v2254_v46 }
 0x67d   :  { %2340 = vpow2.f32 %v1910_v53 }
 0x686   :  { %v2339_v52 = vpop.eup %2338 }
 0x687   :  { %651 = vrot.lane.b32.xlu1 %v2339_v52, %s2445_s3  ;;  %v2341_v15 = vpop.eup %2340 }
 0x688   :  { %v532_v54 = vadd.f32 1.0, %v2341_v15 }
 0x68a   :  { %2342 = vrcp.f32 %v532_v54 }
 0x68b   :  { %2344 = vpow2.f32 %v1913_v55 }
 0x694   :  { %v2343_v57 = vpop.eup %2342 }
 0x695   :  { %v2345_v60 = vpop.eup %2344  ;;  %v536_v1 = vmul.f32 %v2343_v57, %v2624_v21 }
 0x696   :  { %v645_v61 = vadd.f32 1.0, %v2345_v60 }
 0x698   :  { %2346 = vrcp.f32 %v645_v61 }
 0x6a2   :  { %v2347_v62 = vpop.eup %2346 }
 0x6a3   :  { %v649_v5 = vmul.f32 %v2347_v62, %v2627_v27 }
 0x6e5   :  { %v539_v58 = vpop.permute.xlu0 %538 }
 0x6e6   :  { %v541_v59 = vmul.f32 %v2343_v57, %v539_v58 }
 0x6e8   :  { %543 = vrot.lane.b32.xlu0 %v541_v59, %s2445_s3 }
 0x6f9   :  { %v652_v63 = vpop.permute.xlu1 %651 }
 0x6fa   :  { %v654_v0 = vmul.f32 %v2347_v62, %v652_v63 }
 0x6fc   :  { %656 = vrot.lane.b32.xlu1 %v654_v0, %s2445_s3 }
 0x75a   :  { %v544_v2 = vpop.permute.xlu0 %543 }
 0x75b   :  { %v2666_v3 = vadd.f32 %v544_v2, %v536_v1 }
 0x75d   :  { %2348 = vtanh.f32 %v2666_v3 }
 0x767   :  { %v2349_v4 = vpop.eup %2348 }
 0x768   :  { %549 = vrot.lane.b32.xlu0 %v2349_v4, %s2445_s3 }
 0x76e   :  { %v657_v9 = vpop.permute.xlu1 %656 }
 0x76f   :  { %v2671_v10 = vadd.f32 %v657_v9, %v649_v5 }
 0x771   :  { %2350 = vtanh.f32 %v2671_v10 }
 0x77b   :  { %v2351_v11 = vpop.eup %2350 }
 0x77c   :  { %662 = vrot.lane.b32.xlu1 %v2351_v11, %s2445_s3 }
 0x7da   :  { %v550_v12 = vpop.permute.xlu0 %549 }
 0x7db   :  { %v552_v14 = vmul.f32 %v2343_v57, %v550_v12 }
 0x7dd   :  { %v674_v16 = vpack.c.bf16 %v552_v14, %v552_v14 }
 0x7df   :  { %676 = vrot.lane.b32.xlu0 %v674_v16, %s2446_s28 }
 0x7ee   :  { %v663_v18 = vpop.permute.xlu1 %662 }
 0x7ef   :  { %v2676_v19 = vmul.f32 %v2347_v62, %v663_v18 }
 0x7f1   :  { %v787_v21 = vpack.c.bf16 %v2676_v19, %v2676_v19 }
 0x7f3   :  { %789 = vrot.lane.b32.xlu1 %v787_v21, %s2446_s28 }
 0x851   :  { %v677_v23 = vpop.permute.xlu0 %676 }
 0x852   :  { %2106 = vmatmul.mubr.msk.bf16.vlgmr.msra.gmra.mrb[8].mxu0 %vm103_vm0, %v677_v23 }
 0x853   :  { %2110 = vmatpush3.bf16.msra.mxu0 %v2569_v42  ;;  %2113 = vmatprep.mubr.msk.bf16.mxu0 %vm2443_vm1, %v2442_v7 }
 0x854   :  { %2111 = vmatprep.subr.bf16.mxu0 %v2442_v7 }
 0x857   :  { %2112 = vmatpush3.bf16.msra.mxu0 %v2575_v43 }
 0x858   :  { %2117 = vmatprep.subr.bf16.mxu0 %v2442_v7 }
 0x85a   :  { %2114 = vmatmul.mubr.msk.bf16.vlgmr.msra.gmra.mrb[12].mxu0 %vm103_vm0, %v677_v23 }
 0x85b   :  { %2118 = vmatpush3.bf16.msra.mxu0 %v2585_v48  ;;  %2121 = vmatprep.mubr.msk.bf16.mxu0 %vm2443_vm1, %v2442_v7 }
 0x85c   :  { %2119 = vmatprep.subr.bf16.mxu0 %v2442_v7 }
 0x85f   :  { %2120 = vmatpush3.bf16.msra.mxu0 %v2593_v50 }
 0x860   :  { %2149 = vmatprep.subr.bf16.mxu0 %v2442_v7 }
 0x865   :  { %v790_v25 = vpop.permute.xlu1 %789 }
 0x866   :  { %2122 = vmatmul.mubr.msk.bf16.vlgmr.msra.gmra.mrb[12].mxu0 %vm103_vm0, %v790_v25 }
 0x867   :  { %2150 = vmatpush3.bf16.msra.mxu0 %v2519_v6  ;;  %2153 = vmatprep.mubr.msk.bf16.mxu0 %vm2443_vm1, %v2442_v7 }
 0x868   :  { %2151 = vmatprep.subr.bf16.mxu0 %v2442_v7 }
 0x86b   :  { %2152 = vmatpush3.bf16.msra.mxu0 %v2530_v8 }
 0x86c   :  { %2157 = vmatprep.subr.bf16.mxu0 %v2442_v7 }
 0x925   :  { %v715_v26 = vpop.f32.mrb[8].mxu0 }
 0x926   :  { %v721_v27 = vadd.f32 %v715_v26, %v2557_v22  ;;  %v2107_v28 = vpop.f32.mrb[9].mxu0 }
 0x927   :  { %v718_v29 = vpop.f32.mrb[10].mxu0 }
 0x928   :  { %2352 = vtanh.f32 %v721_v27  ;;  %v2108_v30 = vpop.f32.mrb[11].mxu0  ;;  %v1915_v39 = vmul.f32 -1.442695, %v721_v27 }
 0x932   :  { %v2353_v31 = vpop.eup %2352 }
 0x933   :  { %731 = vrot.lane.b32.xlu0 %v2353_v31, %s2445_s3 }
 0x939   :  { %v828_v32 = vpop.f32.mrb[12].mxu0 }
 0x93a   :  { %v2255_v34 = vadd.f32 %v2616_v56, %v828_v32  ;;  %v2123_v35 = vpop.f32.mrb[13].mxu0 }
 0x93b   :  { %v831_v36 = vpop.f32.mrb[14].mxu0 }
 0x93c   :  { %2354 = vtanh.f32 %v2255_v34  ;;  %v2124_v37 = vpop.f32.mrb[15].mxu0  ;;  %v1918_v41 = vmul.f32 -1.442695, %v2255_v34 }
 0x93d   :  { %2356 = vpow2.f32 %v1915_v39 }
 0x946   :  { %v2355_v38 = vpop.eup %2354 }
 0x947   :  { %844 = vrot.lane.b32.xlu1 %v2355_v38, %s2445_s3  ;;  %v2357_v22 = vpop.eup %2356 }
 0x948   :  { %v725_v40 = vadd.f32 1.0, %v2357_v22 }
 0x94a   :  { %2358 = vrcp.f32 %v725_v40 }
 0x94b   :  { %2360 = vpow2.f32 %v1918_v41 }
 0x954   :  { %v2359_v44 = vpop.eup %2358 }
 0x955   :  { %v2361_v47 = vpop.eup %2360  ;;  %v729_v15 = vmul.f32 %v2359_v44, %v2666_v3 }
 0x956   :  { %v838_v49 = vadd.f32 1.0, %v2361_v47 }
 0x958   :  { %2362 = vrcp.f32 %v838_v49 }
 0x962   :  { %v2363_v51 = vpop.eup %2362 }
 0x963   :  { %v842_v58 = vmul.f32 %v2363_v51, %v2671_v10 }
 0x9a5   :  { %v732_v45 = vpop.permute.xlu0 %731 }
 0x9a6   :  { %v734_v46 = vmul.f32 %v2359_v44, %v732_v45 }
 0x9a8   :  { %736 = vrot.lane.b32.xlu0 %v734_v46, %s2445_s3 }
 0x9b9   :  { %v845_v52 = vpop.permute.xlu1 %844 }
 0x9ba   :  { %v847_v53 = vmul.f32 %v2363_v51, %v845_v52 }
 0x9bc   :  { %849 = vrot.lane.b32.xlu1 %v847_v53, %s2445_s3 }
 0xa1a   :  { %v737_v54 = vpop.permute.xlu0 %736 }
 0xa1b   :  { %v2709_v55 = vadd.f32 %v737_v54, %v729_v15 }
 0xa1d   :  { %2364 = vtanh.f32 %v2709_v55 }
 0xa27   :  { %v2365_v57 = vpop.eup %2364 }
 0xa28   :  { %742 = vrot.lane.b32.xlu0 %v2365_v57, %s2445_s3 }
 0xa2e   :  { %v850_v59 = vpop.permute.xlu1 %849 }
 0xa2f   :  { %v2714_v60 = vadd.f32 %v850_v59, %v842_v58 }
 0xa31   :  { %2366 = vtanh.f32 %v2714_v60 }
 0xa3b   :  { %v2367_v61 = vpop.eup %2366 }
 0xa3c   :  { %855 = vrot.lane.b32.xlu1 %v2367_v61, %s2445_s3 }
 0xa9a   :  { %v743_v62 = vpop.permute.xlu0 %742 }
 0xa9b   :  { %v745_v63 = vmul.f32 %v2359_v44, %v743_v62 }
 0xa9d   :  { %v867_v0 = vpack.c.bf16 %v745_v63, %v745_v63 }
 0xa9f   :  { %869 = vrot.lane.b32.xlu0 %v867_v0, %s2446_s28 }
 0xaae   :  { %v856_v1 = vpop.permute.xlu1 %855 }
 0xaaf   :  { %v2719_v2 = vmul.f32 %v2363_v51, %v856_v1 }
 0xab1   :  { %v980_v3 = vpack.c.bf16 %v2719_v2, %v2719_v2 }
 0xab3   :  { %982 = vrot.lane.b32.xlu1 %v980_v3, %s2446_s28 }
 0xb11   :  { %v870_v4 = vpop.permute.xlu0 %869 }
 0xb12   :  { %2130 = vmatmul.mubr.msk.bf16.vlgmr.msra.gmra.mrb[20].mxu1 %vm103_vm0, %v870_v4 }
 0xb13   :  { %2134 = vmatpush3.bf16.msra.mxu1 %v2569_v42  ;;  %2137 = vmatprep.mubr.msk.bf16.mxu1 %vm2443_vm1, %v2442_v7 }
 0xb14   :  { %2135 = vmatprep.subr.bf16.mxu1 %v2442_v7 }
 0xb17   :  { %2136 = vmatpush3.bf16.msra.mxu1 %v2575_v43 }
 0xb18   :  { %2141 = vmatprep.subr.bf16.mxu1 %v2442_v7 }
 0xb1a   :  { %2138 = vmatmul.mubr.msk.bf16.vlgmr.msra.gmra.mrb[24].mxu1 %vm103_vm0, %v870_v4 }
 0xb1b   :  { %2142 = vmatpush3.bf16.msra.mxu1 %v2585_v48  ;;  %2145 = vmatprep.mubr.msk.bf16.mxu1 %vm2443_vm1, %v2442_v7 }
 0xb1c   :  { %2143 = vmatprep.subr.bf16.mxu1 %v2442_v7 }
 0xb1f   :  { %2144 = vmatpush3.bf16.msra.mxu1 %v2593_v50 }
 0xb20   :  { %2173 = vmatprep.subr.bf16.mxu1 %v2442_v7 }
 0xb25   :  { %v983_v5 = vpop.permute.xlu1 %982 }
 0xb26   :  { %2146 = vmatmul.mubr.msk.bf16.vlgmr.msra.gmra.mrb[24].mxu1 %vm103_vm0, %v983_v5 }
 0xb27   :  { %2174 = vmatpush3.bf16.msra.mxu1 %v2519_v6  ;;  %2177 = vmatprep.mubr.msk.bf16.mxu1 %vm2443_vm1, %v2442_v7 }
 0xb28   :  { %2175 = vmatprep.subr.bf16.mxu1 %v2442_v7 }
 0xb2b   :  { %2176 = vmatpush3.bf16.msra.mxu1 %v2530_v8 }
 0xb2c   :  { %2181 = vmatprep.subr.bf16.mxu1 %v2442_v7 }
 0xbe5   :  { %v908_v9 = vpop.f32.mrb[20].mxu1 }
 0xbe6   :  { %v914_v10 = vadd.f32 %v908_v9, %v2553_v17  ;;  %v2131_v11 = vpop.f32.mrb[21].mxu1 }
 0xbe7   :  { %v911_v12 = vpop.f32.mrb[22].mxu1 }
 0xbe8   :  { %2368 = vtanh.f32 %v914_v10  ;;  %v2132_v14 = vpop.f32.mrb[23].mxu1  ;;  %v1920_v28 = vmul.f32 -1.442695, %v914_v10 }
 0xbf2   :  { %v2369_v16 = vpop.eup %2368 }
 0xbf3   :  { %924 = vrot.lane.b32.xlu0 %v2369_v16, %s2445_s3 }
 0xbf9   :  { %v1021_v18 = vpop.f32.mrb[24].mxu1 }
 0xbfa   :  { %v2256_v21 = vadd.f32 %v2616_v56, %v1021_v18  ;;  %v2147_v23 = vpop.f32.mrb[25].mxu1 }
 0xbfb   :  { %v1024_v25 = vpop.f32.mrb[26].mxu1 }
 0xbfc   :  { %2370 = vtanh.f32 %v2256_v21  ;;  %v2148_v26 = vpop.f32.mrb[27].mxu1  ;;  %v1923_v30 = vmul.f32 -1.442695, %v2256_v21 }
 0xbfd   :  { %2372 = vpow2.f32 %v1920_v28 }
 0xc06   :  { %v2371_v27 = vpop.eup %2370 }
 0xc07   :  { %1037 = vrot.lane.b32.xlu1 %v2371_v27, %s2445_s3  ;;  %v2373_v17 = vpop.eup %2372 }
 0xc08   :  { %v918_v29 = vadd.f32 1.0, %v2373_v17 }
 0xc0a   :  { %2374 = vrcp.f32 %v918_v29 }
 0xc0b   :  { %2376 = vpow2.f32 %v1923_v30 }
 0xc14   :  { %v2375_v31 = vpop.eup %2374 }
 0xc15   :  { %v2377_v35 = vpop.eup %2376  ;;  %v922_v22 = vmul.f32 %v2375_v31, %v2709_v55 }
 0xc16   :  { %v1031_v36 = vadd.f32 1.0, %v2377_v35 }
 0xc18   :  { %2378 = vrcp.f32 %v1031_v36 }
 0xc22   :  { %v2379_v37 = vpop.eup %2378 }
 0xc23   :  { %v1035_v45 = vmul.f32 %v2379_v37, %v2714_v60 }
 0xc65   :  { %v925_v32 = vpop.permute.xlu0 %924 }
 0xc66   :  { %v927_v34 = vmul.f32 %v2375_v31, %v925_v32 }
 0xc68   :  { %929 = vrot.lane.b32.xlu0 %v927_v34, %s2445_s3 }
 0xc79   :  { %v1038_v38 = vpop.permute.xlu1 %1037 }
 0xc7a   :  { %v1040_v39 = vmul.f32 %v2379_v37, %v1038_v38 }
 0xc7c   :  { %1042 = vrot.lane.b32.xlu1 %v1040_v39, %s2445_s3 }
 0xcda   :  { %v930_v40 = vpop.permute.xlu0 %929 }
 0xcdb   :  { %v2752_v41 = vadd.f32 %v930_v40, %v922_v22 }
 0xcdd   :  { %2380 = vtanh.f32 %v2752_v41 }
 0xce7   :  { %v2381_v44 = vpop.eup %2380 }
 0xce8   :  { %935 = vrot.lane.b32.xlu0 %v2381_v44, %s2445_s3 }
 0xcee   :  { %v1043_v46 = vpop.permute.xlu1 %1042 }
 0xcef   :  { %v2757_v47 = vadd.f32 %v1043_v46, %v1035_v45 }
 0xcf1   :  { %2382 = vtanh.f32 %v2757_v47 }
 0xcfb   :  { %v2383_v49 = vpop.eup %2382 }
 0xcfc   :  { %1048 = vrot.lane.b32.xlu1 %v2383_v49, %s2445_s3 }
 0xd5a   :  { %v936_v51 = vpop.permute.xlu0 %935 }
 0xd5b   :  { %v938_v52 = vmul.f32 %v2375_v31, %v936_v51 }
 0xd5d   :  { %v1060_v53 = vpack.c.bf16 %v938_v52, %v938_v52 }
 0xd5f   :  { %1062 = vrot.lane.b32.xlu0 %v1060_v53, %s2446_s28 }
 0xd6e   :  { %v1049_v15 = vpop.permute.xlu1 %1048 }
 0xd6f   :  { %v2762_v54 = vmul.f32 %v2379_v37, %v1049_v15 }
 0xd71   :  { %v1173_v55 = vpack.c.bf16 %v2762_v54, %v2762_v54 }
 0xd73   :  { %1175 = vrot.lane.b32.xlu1 %v1173_v55, %s2446_s28 }
 0xdd1   :  { %v1063_v57 = vpop.permute.xlu0 %1062 }
 0xdd2   :  { %2154 = vmatmul.mubr.msk.bf16.vlgmr.msra.gmra.mrb[16].mxu0 %vm103_vm0, %v1063_v57 }
 0xdd3   :  { %2158 = vmatpush3.bf16.msra.mxu0 %v2569_v42  ;;  %2161 = vmatprep.mubr.msk.bf16.mxu0 %vm2443_vm1, %v2442_v7 }
 0xdd4   :  { %2159 = vmatprep.subr.bf16.mxu0 %v2442_v7 }
 0xdd7   :  { %2160 = vmatpush3.bf16.msra.mxu0 %v2575_v43 }
 0xdd8   :  { %2165 = vmatprep.subr.bf16.mxu0 %v2442_v7 }
 0xdda   :  { %2162 = vmatmul.mubr.msk.bf16.vlgmr.msra.gmra.mrb[20].mxu0 %vm103_vm0, %v1063_v57 }
 0xddb   :  { %2166 = vmatpush3.bf16.msra.mxu0 %v2585_v48  ;;  %2169 = vmatprep.mubr.msk.bf16.mxu0 %vm2443_vm1, %v2442_v7 }
 0xddc   :  { %2167 = vmatprep.subr.bf16.mxu0 %v2442_v7 }
 0xddf   :  { %2168 = vmatpush3.bf16.msra.mxu0 %v2593_v50 }
 0xde0   :  { %2197 = vmatprep.subr.bf16.mxu0 %v2442_v7 }
 0xde5   :  { %v1176_v58 = vpop.permute.xlu1 %1175 }
 0xde6   :  { %2170 = vmatmul.mubr.msk.bf16.vlgmr.msra.gmra.mrb[20].mxu0 %vm103_vm0, %v1176_v58 }
 0xde7   :  { %2198 = vmatpush3.bf16.msra.mxu0 %v2519_v6  ;;  %2201 = vmatprep.mubr.msk.bf16.mxu0 %vm2443_vm1, %v2442_v7 }
 0xde8   :  { %2199 = vmatprep.subr.bf16.mxu0 %v2442_v7 }
 0xdeb   :  { %2200 = vmatpush3.bf16.msra.mxu0 %v2530_v8 }
 0xdec   :  { %2205 = vmatprep.subr.bf16.mxu0 %v2442_v7 }
 0xea5   :  { %v1101_v59 = vpop.f32.mrb[16].mxu0 }
 0xea6   :  { %v1107_v60 = vadd.f32 %v1101_v59, %v2559_v24  ;;  %v2155_v61 = vpop.f32.mrb[17].mxu0 }
 0xea7   :  { %v1104_v62 = vpop.f32.mrb[18].mxu0 }
 0xea8   :  { %2384 = vtanh.f32 %v1107_v60  ;;  %v2156_v63 = vpop.f32.mrb[19].mxu0  ;;  %v1925_v9 = vmul.f32 -1.442695, %v1107_v60 }
 0xeb2   :  { %v2385_v0 = vpop.eup %2384 }
 0xeb3   :  { %1117 = vrot.lane.b32.xlu0 %v2385_v0, %s2445_s3 }
 0xeb9   :  { %v1214_v6 = vpop.f32.mrb[20].mxu0 }
 0xeba   :  { %v2257_v1 = vadd.f32 %v2616_v56, %v1214_v6  ;;  %v2171_v3 = vpop.f32.mrb[21].mxu0 }
 0xebb   :  { %v1217_v4 = vpop.f32.mrb[22].mxu0 }
 0xebc   :  { %2386 = vtanh.f32 %v2257_v1  ;;  %v2172_v5 = vpop.f32.mrb[23].mxu0  ;;  %v1928_v11 = vmul.f32 -1.442695, %v2257_v1 }
 0xebd   :  { %2388 = vpow2.f32 %v1925_v9 }
 0xec6   :  { %v2387_v8 = vpop.eup %2386 }
 0xec7   :  { %1230 = vrot.lane.b32.xlu1 %v2387_v8, %s2445_s3  ;;  %v2389_v24 = vpop.eup %2388 }
 0xec8   :  { %v1111_v10 = vadd.f32 1.0, %v2389_v24 }
 0xeca   :  { %2390 = vrcp.f32 %v1111_v10 }
 0xecb   :  { %2392 = vpow2.f32 %v1928_v11 }
 0xed4   :  { %v2391_v12 = vpop.eup %2390 }
 0xed5   :  { %v2393_v18 = vpop.eup %2392  ;;  %v1115_v27 = vmul.f32 %v2391_v12, %v2752_v41 }
 0xed6   :  { %v1224_v21 = vadd.f32 1.0, %v2393_v18 }
 0xed8   :  { %2394 = vrcp.f32 %v1224_v21 }
 0xee2   :  { %v2395_v23 = vpop.eup %2394 }
 0xee3   :  { %v1228_v30 = vmul.f32 %v2395_v23, %v2757_v47 }
 0xf25   :  { %v1118_v14 = vpop.permute.xlu0 %1117 }
 0xf26   :  { %v1120_v16 = vmul.f32 %v2391_v12, %v1118_v14 }
 0xf28   :  { %1122 = vrot.lane.b32.xlu0 %v1120_v16, %s2445_s3 }
 0xf39   :  { %v1231_v25 = vpop.permute.xlu1 %1230 }
 0xf3a   :  { %v1233_v26 = vmul.f32 %v2395_v23, %v1231_v25 }
 0xf3c   :  { %1235 = vrot.lane.b32.xlu1 %v1233_v26, %s2445_s3 }
 0xf9a   :  { %v1123_v28 = vpop.permute.xlu0 %1122 }
 0xf9b   :  { %v2795_v17 = vadd.f32 %v1123_v28, %v1115_v27 }
 0xf9d   :  { %2396 = vtanh.f32 %v2795_v17 }
 0xfa7   :  { %v2397_v29 = vpop.eup %2396 }
 0xfa8   :  { %1128 = vrot.lane.b32.xlu0 %v2397_v29, %s2445_s3 }
 0xfae   :  { %v1236_v31 = vpop.permute.xlu1 %1235 }
 0xfaf   :  { %v2800_v32 = vadd.f32 %v1236_v31, %v1228_v30 }
 0xfb1   :  { %2398 = vtanh.f32 %v2800_v32 }
 0xfbb   :  { %v2399_v34 = vpop.eup %2398 }
 0xfbc   :  { %1241 = vrot.lane.b32.xlu1 %v2399_v34, %s2445_s3 }
0x101a   :  { %v1129_v35 = vpop.permute.xlu0 %1128 }
0x101b   :  { %v1131_v36 = vmul.f32 %v2391_v12, %v1129_v35 }
0x101d   :  { %v1253_v37 = vpack.c.bf16 %v1131_v36, %v1131_v36 }
0x101f   :  { %1255 = vrot.lane.b32.xlu0 %v1253_v37, %s2446_s28 }
0x102e   :  { %v1242_v38 = vpop.permute.xlu1 %1241 }
0x102f   :  { %v2805_v39 = vmul.f32 %v2395_v23, %v1242_v38 }
0x1031   :  { %v1366_v22 = vpack.c.bf16 %v2805_v39, %v2805_v39 }
0x1033   :  { %1368 = vrot.lane.b32.xlu1 %v1366_v22, %s2446_s28 }
0x1091   :  { %v1256_v40 = vpop.permute.xlu0 %1255 }
0x1092   :  { %2178 = vmatmul.mubr.msk.bf16.vlgmr.msra.gmra.mrb[28].mxu1 %vm103_vm0, %v1256_v40 }
0x1093   :  { %2182 = vmatpush3.bf16.msra.mxu1 %v2569_v42  ;;  %2185 = vmatprep.mubr.msk.bf16.mxu1 %vm2443_vm1, %v2442_v7 }
0x1094   :  { %2183 = vmatprep.subr.bf16.mxu1 %v2442_v7 }
0x1097   :  { %2184 = vmatpush3.bf16.msra.mxu1 %v2575_v43 }
0x1098   :  { %2189 = vmatprep.subr.bf16.mxu1 %v2442_v7 }
0x109a   :  { %2186 = vmatmul.mubr.msk.bf16.vlgmr.msra.gmra.mrb[32].mxu1 %vm103_vm0, %v1256_v40 }
0x109b   :  { %2190 = vmatpush3.bf16.msra.mxu1 %v2585_v48  ;;  %2193 = vmatprep.mubr.msk.bf16.mxu1 %vm2443_vm1, %v2442_v7 }
0x109c   :  { %2191 = vmatprep.subr.bf16.mxu1 %v2442_v7 }
0x109f   :  { %2192 = vmatpush3.bf16.msra.mxu1 %v2593_v50 }
0x10a0   :  { %2221 = vmatprep.subr.bf16.mxu1 %v2442_v7 }
0x10a5   :  { %v1369_v41 = vpop.permute.xlu1 %1368 }
0x10a6   :  { %2194 = vmatmul.mubr.msk.bf16.vlgmr.msra.gmra.mrb[32].mxu1 %vm103_vm0, %v1369_v41 }
0x10a7   :  { %2222 = vmatpush3.bf16.msra.mxu1 %v2569_v42  ;;  %2225 = vmatprep.mubr.msk.bf16.mxu1 %vm2443_vm1, %v2442_v7 }
0x10a8   :  { %2223 = vmatprep.subr.bf16.mxu1 %v2442_v7 }
0x10ab   :  { %2224 = vmatpush3.bf16.msra.mxu1 %v2575_v43 }
0x10ac   :  { %2229 = vmatprep.subr.bf16.mxu1 %v2442_v7 }
0x1165   :  { %v1294_v44 = vpop.f32.mrb[28].mxu1 }
0x1166   :  { %v1300_v45 = vadd.f32 %v1294_v44, %v2549_v13  ;;  %v2179_v46 = vpop.f32.mrb[29].mxu1 }
0x1167   :  { %v1297_v47 = vpop.f32.mrb[30].mxu1 }
0x1168   :  { %2400 = vtanh.f32 %v1300_v45  ;;  %v2180_v49 = vpop.f32.mrb[31].mxu1  ;;  %v1930_v59 = vmul.f32 -1.442695, %v1300_v45 }
0x1172   :  { %v2401_v51 = vpop.eup %2400 }
0x1173   :  { %1310 = vrot.lane.b32.xlu0 %v2401_v51, %s2445_s3 }
0x1179   :  { %v1407_v52 = vpop.f32.mrb[32].mxu1 }
0x117a   :  { %v2258_v53 = vadd.f32 %v2616_v56, %v1407_v52  ;;  %v2195_v15 = vpop.f32.mrb[33].mxu1 }
0x117b   :  { %v1410_v55 = vpop.f32.mrb[34].mxu1 }
0x117c   :  { %2402 = vtanh.f32 %v2258_v53  ;;  %v2196_v57 = vpop.f32.mrb[35].mxu1  ;;  %v1933_v61 = vmul.f32 -1.442695, %v2258_v53 }
0x117d   :  { %2404 = vpow2.f32 %v1930_v59 }
0x1186   :  { %v2403_v58 = vpop.eup %2402 }
0x1187   :  { %1423 = vrot.lane.b32.xlu1 %v2403_v58, %s2445_s3  ;;  %v2405_v13 = vpop.eup %2404 }
0x1188   :  { %v1304_v60 = vadd.f32 1.0, %v2405_v13 }
0x118a   :  { %2406 = vrcp.f32 %v1304_v60 }
0x118b   :  { %2408 = vpow2.f32 %v1933_v61 }
0x1194   :  { %v2407_v62 = vpop.eup %2406 }
0x1195   :  { %v2409_v6 = vpop.eup %2408  ;;  %v1308_v8 = vmul.f32 %v2407_v62, %v2795_v17 }
0x1196   :  { %v1417_v1 = vadd.f32 1.0, %v2409_v6 }
0x1198   :  { %2410 = vrcp.f32 %v1417_v1 }
0x11a2   :  { %v2411_v3 = vpop.eup %2410 }
0x11a3   :  { %v1421_v11 = vmul.f32 %v2411_v3, %v2800_v32 }
0x11e5   :  { %v1311_v63 = vpop.permute.xlu0 %1310 }
0x11e6   :  { %v1313_v0 = vmul.f32 %v2407_v62, %v1311_v63 }
0x11e8   :  { %1315 = vrot.lane.b32.xlu0 %v1313_v0, %s2445_s3 }
0x11f9   :  { %v1424_v4 = vpop.permute.xlu1 %1423 }
0x11fa   :  { %v1426_v5 = vmul.f32 %v2411_v3, %v1424_v4  ;;  %v2440_v4 = vld [vmem:[%s2958_s5] sm:$0xff]  }
0x11fc   :  { %1428 = vrot.lane.b32.xlu1 %v1426_v5, %s2445_s3  ;;  %v2441_v5 = vld [vmem:[%s2958_s5 + $0x8] sm:$0xff]  }
0x125a   :  { %v1316_v9 = vpop.permute.xlu0 %1315 }
0x125b   :  { %v2838_v24 = vadd.f32 %v1316_v9, %v1308_v8 }
0x125d   :  { %2412 = vtanh.f32 %v2838_v24 }
0x1267   :  { %v2413_v10 = vpop.eup %2412 }
0x1268   :  { %1321 = vrot.lane.b32.xlu0 %v2413_v10, %s2445_s3 }
0x126e   :  { %v1429_v12 = vpop.permute.xlu1 %1428 }
0x126f   :  { %v2843_v14 = vadd.f32 %v1429_v12, %v1421_v11 }
0x1271   :  { %2414 = vtanh.f32 %v2843_v14 }
0x127b   :  { %v2415_v16 = vpop.eup %2414 }
0x127c   :  { %1434 = vrot.lane.b32.xlu1 %v2415_v16, %s2445_s3 }
0x12da   :  { %v1322_v18 = vpop.permute.xlu0 %1321 }
0x12db   :  { %v1324_v21 = vmul.f32 %v2407_v62, %v1322_v18 }
0x12dd   :  { %v1446_v23 = vpack.c.bf16 %v1324_v21, %v1324_v21 }
0x12df   :  { %1448 = vrot.lane.b32.xlu0 %v1446_v23, %s2446_s28 }
0x12ee   :  { %v1435_v25 = vpop.permute.xlu1 %1434 }
0x12ef   :  { %v2848_v26 = vmul.f32 %v2411_v3, %v1435_v25 }
0x12f1   :  { %v1559_v27 = vpack.c.bf16 %v2848_v26, %v2848_v26 }
0x12f3   :  { %1561 = vrot.lane.b32.xlu1 %v1559_v27, %s2446_s28 }
0x1351   :  { %v1449_v28 = vpop.permute.xlu0 %1448 }
0x1352   :  { %2202 = vmatmul.mubr.msk.bf16.vlgmr.msra.gmra.mrb[24].mxu0 %vm103_vm0, %v1449_v28 }
0x1353   :  { %2206 = vmatpush3.bf16.msra.mxu0 %v2569_v42  ;;  %2209 = vmatprep.mubr.msk.bf16.mxu0 %vm2443_vm1, %v2442_v7 }
0x1354   :  { %2207 = vmatprep.subr.bf16.mxu0 %v2442_v7 }
0x1357   :  { %2208 = vmatpush3.bf16.msra.mxu0 %v2575_v43 }
0x1358   :  { %2213 = vmatprep.subr.bf16.mxu0 %v2442_v7 }
0x135a   :  { %2210 = vmatmul.mubr.msk.bf16.vlgmr.msra.gmra.mrb[28].mxu0 %vm103_vm0, %v1449_v28 }
0x135b   :  { %2214 = vmatpush3.bf16.msra.mxu0 %v2585_v48  ;;  %2217 = vmatprep.mubr.msk.bf16.mxu0 %vm2443_vm1, %v2442_v7 }
0x135c   :  { %2215 = vmatprep.subr.bf16.mxu0 %v2442_v7 }
0x135f   :  { %2216 = vmatpush3.bf16.msra.mxu0 %v2593_v50 }
0x1365   :  { %v1562_v42 = vpop.permute.xlu1 %1561 }
0x1366   :  { %2218 = vmatmul.mubr.msk.bf16.vlgmr.msra.gmra.mrb[28].mxu0 %vm103_vm0, %v1562_v42 }
0x1425   :  { %v1487_v17 = vpop.f32.mrb[24].mxu0 }
0x1426   :  { %v1493_v29 = vadd.f32 %v1487_v17, %v2555_v20  ;;  %v2203_v43 = vpop.f32.mrb[25].mxu0 }
0x1427   :  { %v1490_v30 = vpop.f32.mrb[26].mxu0 }
0x1428   :  { %2416 = vtanh.f32 %v1493_v29  ;;  %v2204_v31 = vpop.f32.mrb[27].mxu0  ;;  %v1935_v38 = vmul.f32 -1.442695, %v1493_v29  ;;  %v2311_v29 = vld [vmem:[%s2960_s7 + $0x8] sm:$0xff]  }
0x1432   :  { %v2417_v32 = vpop.eup %2416 }
0x1433   :  { %1503 = vrot.lane.b32.xlu0 %v2417_v32, %s2445_s3 }
0x1439   :  { %v1600_v48 = vpop.f32.mrb[28].mxu0 }
0x143a   :  { %v2259_v34 = vadd.f32 %v2616_v56, %v1600_v48  ;;  %v2219_v35 = vpop.f32.mrb[29].mxu0 }
0x143b   :  { %v1603_v36 = vpop.f32.mrb[30].mxu0 }
0x143c   :  { %2418 = vtanh.f32 %v2259_v34  ;;  %v2220_v50 = vpop.f32.mrb[31].mxu0  ;;  %v1938_v40 = vmul.f32 -1.442695, %v2259_v34 }
0x143d   :  { %2420 = vpow2.f32 %v1935_v38 }
0x1446   :  { %v2419_v37 = vpop.eup %2418 }
0x1447   :  { %1616 = vrot.lane.b32.xlu1 %v2419_v37, %s2445_s3  ;;  %v2421_v20 = vpop.eup %2420 }
0x1448   :  { %v1497_v22 = vadd.f32 1.0, %v2421_v20 }
0x144a   :  { %2422 = vrcp.f32 %v1497_v22 }
0x144b   :  { %2424 = vpow2.f32 %v1938_v40 }
0x1454   :  { %v2423_v41 = vpop.eup %2422 }
0x1455   :  { %v2425_v46 = vpop.eup %2424  ;;  %v1501_v53 = vmul.f32 %v2423_v41, %v2838_v24 }
0x1456   :  { %v1610_v47 = vadd.f32 1.0, %v2425_v46 }
0x1458   :  { %2426 = vrcp.f32 %v1610_v47 }
0x1462   :  { %v2427_v49 = vpop.eup %2426 }
0x1463   :  { %v1614_v58 = vmul.f32 %v2427_v49, %v2843_v14 }
0x14a5   :  { %v1504_v44 = vpop.permute.xlu0 %1503 }
0x14a6   :  { %v1506_v45 = vmul.f32 %v2423_v41, %v1504_v44 }
0x14a8   :  { %1508 = vrot.lane.b32.xlu0 %v1506_v45, %s2445_s3  ;;  %v1942_v45 = vld [vmem:[%s2961_s8] ss:$0 sm:$0xff] }
0x14b9   :  { %v1617_v51 = vpop.permute.xlu1 %1616 }
0x14ba   :  { %v1619_v52 = vmul.f32 %v2427_v49, %v1617_v51 }
0x14bc   :  { %1621 = vrot.lane.b32.xlu1 %v1619_v52, %s2445_s3 }
0x151a   :  { %v1509_v15 = vpop.permute.xlu0 %1508 }
0x151b   :  { %v1511_v55 = vadd.f32 %v1509_v15, %v1501_v53 }
0x151d   :  { %2428 = vtanh.f32 %v1511_v55 }
0x1527   :  { %v2429_v57 = vpop.eup %2428 }
0x1528   :  { %1514 = vrot.lane.b32.xlu0 %v2429_v57, %s2445_s3 }
0x152e   :  { %v1622_v59 = vpop.permute.xlu1 %1621 }
0x152f   :  { %v1624_v13 = vadd.f32 %v1622_v59, %v1614_v58 }
0x1531   :  { %2430 = vtanh.f32 %v1624_v13 }
0x153b   :  { %v2431_v60 = vpop.eup %2430 }
0x153c   :  { %1627 = vrot.lane.b32.xlu1 %v2431_v60, %s2445_s3 }
0x159a   :  { %v1515_v61 = vpop.permute.xlu0 %1514 }
0x159b   :  { %v1517_v62 = vmul.f32 %v2423_v41, %v1515_v61 }
0x159d   :  { %v1637_v63 = vpack.c.bf16 %v1517_v62, %v1517_v62 }
0x159f   :  { %1639 = vrot.lane.b32.xlu0 %v1637_v63, %s2446_s28 }
0x15ae   :  { %v1628_v0 = vpop.permute.xlu1 %1627 }
0x15af   :  { %v1630_v6 = vmul.f32 %v2427_v49, %v1628_v0 }
0x15b1   :  { %v1685_v1 = vpack.c.bf16 %v1630_v6, %v1630_v6 }
0x15b3   :  { %1687 = vrot.lane.b32.xlu1 %v1685_v1, %s2446_s28 }
0x1611   :  { %v1640_v3 = vpop.permute.xlu0 %1639 }
0x1612   :  { %2226 = vmatmul.mubr.msk.bf16.vlgmr.msra.gmra.mrb[36].mxu1 %vm103_vm0, %v1640_v3 }
0x1613   :  { %2230 = vmatpush3.bf16.msra.mxu1 %v2440_v4  ;;  %2233 = vmatprep.mubr.msk.bf16.mxu1 %vm2443_vm1, %v2442_v7 }
0x1614   :  { %2231 = vmatprep.subr.bf16.mxu1 %v2442_v7 }
0x1617   :  { %2232 = vmatpush3.bf16.msra.mxu1 %v2441_v5 }
0x1625   :  { %v1688_v8 = vpop.permute.xlu1 %1687 }
0x1626   :  { %2234 = vmatmul.mubr.msk.bf16.vlgmr.msra.gmra.mrb[36].mxu1 %vm103_vm0, %v1688_v8 }
0x16f9   :  { %v1726_v9 = vpop.f32.mrb[36].mxu1 }
0x16fa   :  { %v2260_v24 = vadd.f32 %v2616_v56, %v1726_v9  ;;  %v2235_v10 = vpop.f32.mrb[37].mxu1 }
0x16fb   :  { %v1729_v11 = vpop.f32.mrb[38].mxu1 }
0x16fc   :  { %2432 = vtanh.f32 %v2260_v24  ;;  %v2236_v12 = vpop.f32.mrb[39].mxu1  ;;  %v1941_v16 = vmul.f32 -1.442695, %v2260_v24 }
0x16fe   :  { %2434 = vpow2.f32 %v1941_v16 }
0x1706   :  { %v2433_v14 = vpop.eup %2432 }
0x1707   :  { %1742 = vrot.lane.b32.xlu0 %v2433_v14, %s2445_s3 }
0x1708   :  { %v2435_v7 = vpop.eup %2434 }
0x1709   :  { %v1736_v18 = vadd.f32 1.0, %v2435_v7 }
0x170b   :  { %2436 = vrcp.f32 %v1736_v18 }
0x1715   :  { %v2437_v21 = vpop.eup %2436 }
0x1716   :  { %v1740_v56 = vmul.f32 %v2437_v21, %v1624_v13 }
0x1779   :  { %v1743_v23 = vpop.permute.xlu0 %1742 }
0x177a   :  { %v1745_v25 = vmul.f32 %v2437_v21, %v1743_v23 }
0x177c   :  { %1747 = vrot.lane.b32.xlu1 %v1745_v25, %s2445_s3 }
0x1780   :  { %475 = vrot.lane.b32.xlu1 %v2633_v33, %s2446_s28  ;;  %v2310_v33 = vld [vmem:[%s2960_s7] sm:$0xff]  }
0x1781   :  { %2237 = vmatprep.subr.bf16.mxu0 %v2310_v33 }
0x1782   :  { %2238 = vmatpush3.bf16.msra.mxu0 %v2310_v33 }
0x1783   :  { %2239 = vmatprep.subr.bf16.mxu0 %v2311_v29 }
0x1784   :  { %860 = vrot.lane.b32.xlu1 %v2719_v2, %s2446_s28 }
0x1786   :  { %2240 = vmatpush3.bf16.msra.mxu0 %v2311_v29 }
0x1788   :  { %1246 = vrot.lane.b32.xlu1 %v2805_v39, %s2446_s28 }
0x178c   :  { %1632 = vrot.lane.b32.xlu1 %v1630_v6, %s2446_s28 }
0x17ee   :  { %v1748_v27 = vpop.permute.xlu1 %1747 }
0x17ef   :  { %v1750_v28 = vadd.f32 %v1748_v27, %v1740_v56 }
0x17f1   :  { %2438 = vtanh.f32 %v1750_v28 }
0x17f2   :  { %v476_v42 = vpop.permute.xlu1 %475 }
0x17f3   :  { %478 = vst.msk [vmem:[#allocation3] sm:$0xff] %vm103_vm0, %v476_v42 }
0x17f6   :  { %v861_v17 = vpop.permute.xlu1 %860 }
0x17f7   :  { %864 = vst.msk [vmem:[#allocation3 + $0x10] sm:$0xff] %vm103_vm0, %v861_v17 }
0x17fa   :  { %v1247_v2 = vpop.permute.xlu1 %1246  ;;  %v1762_v35 = vld [vmem:[#allocation3] sm:$0xff] }
0x17fb   :  { %v2439_v39 = vpop.eup %2438  ;;  %1250 = vst.msk [vmem:[#allocation3 + $0x20] sm:$0xff] %vm103_vm0, %v1247_v2 }
0x17fc   :  { %1753 = vrot.lane.b32.xlu0 %v2439_v39, %s2445_s3 }
0x17fe   :  { %v1633_v43 = vpop.permute.xlu1 %1632 }
0x17ff   :  { %1636 = vst.msk [vmem:[#allocation3 + $0x30] sm:$0xff] %vm103_vm0, %v1633_v43 }
0x1800   :  { %667 = vrot.lane.b32.xlu0 %v2676_v19, %s2446_s28 }
0x1802   :  { %v1766_v37 = vld [vmem:[#allocation3 + $0x20] sm:$0xff] }
0x1804   :  { %1053 = vrot.lane.b32.xlu0 %v2762_v54, %s2446_s28  ;;  %v1764_v54 = vld [vmem:[#allocation3 + $0x10] sm:$0xff] }
0x1806   :  { %v1768_v40 = vld [vmem:[#allocation3 + $0x30] sm:$0xff] }
0x1808   :  { %1439 = vrot.lane.b32.xlu0 %v2848_v26, %s2446_s28 }
0x186e   :  { %v1754_v30 = vpop.permute.xlu0 %1753 }
0x186f   :  { %v1756_v31 = vmul.f32 %v2437_v21, %v1754_v30 }
0x1871   :  { %1758 = vrot.lane.b32.xlu0 %v1756_v31, %s2446_s28 }
0x1872   :  { %v668_v32 = vpop.permute.xlu0 %667 }
0x1873   :  { %671 = vst.msk [vmem:[#allocation3 + $0x8] sm:$0xff] %vm103_vm0, %v668_v32 }
0x1876   :  { %v1054_v48 = vpop.permute.xlu0 %1053 }
0x1877   :  { %1057 = vst.msk [vmem:[#allocation3 + $0x18] sm:$0xff] %vm103_vm0, %v1054_v48 }
0x187a   :  { %v1440_v34 = vpop.permute.xlu0 %1439  ;;  %v1763_v36 = vld [vmem:[#allocation3 + $0x8] sm:$0xff] }
0x187b   :  { %1443 = vst.msk [vmem:[#allocation3 + $0x28] sm:$0xff] %vm103_vm0, %v1440_v34  ;;  %v1770_v19 = vpack.c.bf16 %v1763_v36, %v1762_v35 }
0x187d   :  { %2241 = vmatprep.mubr.msk.bf16.mxu0 %vm103_vm0, %v1770_v19 }
0x187e   :  { %v1765_v26 = vld [vmem:[#allocation3 + $0x18] sm:$0xff] }
0x187f   :  { %v1771_v50 = vpack.c.bf16 %v1765_v26, %v1764_v54 }
0x1881   :  { %2242 = vmatmul.mubr.msk.bf16.vlgmr.msra.gmra.mrb[32].mxu0 %vm103_vm0, %v1771_v50 }
0x1882   :  { %v1767_v38 = vld [vmem:[#allocation3 + $0x28] sm:$0xff] }
0x1883   :  { %v1772_v20 = vpack.c.bf16 %v1767_v38, %v1766_v37 }
0x1885   :  { %2245 = vmatprep.mubr.msk.bf16.mxu0 %vm103_vm0, %v1772_v20 }
0x18e3   :  { %v1759_v22 = vpop.permute.xlu0 %1758 }
0x18e4   :  { %1761 = vst.msk [vmem:[#allocation3 + $0x38] sm:$0xff] %vm103_vm0, %v1759_v22 }
0x18eb   :  { %v1769_v41 = vld [vmem:[#allocation3 + $0x38] sm:$0xff] }
0x18ec   :  { %v1773_v44 = vpack.c.bf16 %v1769_v41, %v1768_v40 }
0x18ee   :  { %2246 = vmatmul.mubr.msk.bf16.gmra.mrb[36].mxu0 %vm103_vm0, %v1773_v44 }
0x1954   :  { %v2243_v46 = vpop.f32.mrb[32].mxu0 }
0x1955   :  { %v1852_v47 = vadd.f32 %v2243_v46, %v1942_v45  ;;  %v1843_v49 = vpop.f32.mrb[33].mxu0 }
0x1956   :  { %v1844_v51 = vadd.f32 %v1942_v45, %v1843_v49  ;;  %v2244_v52 = vpop.f32.mrb[34].mxu0 }
0x1957   :  { %1876 = vst [vmem:[%s2962_s9 + $0x10] sm:$0xff] %v1852_v47  ;;  %v1855_v53 = vadd.f32 %v2244_v52, %v1942_v45  ;;  %v1846_v15 = vpop.f32.mrb[35].mxu0 }
0x1958   :  { %1874 = vst [vmem:[%s2962_s9] sm:$0xff] %v1844_v51  ;;  %v1847_v55 = vadd.f32 %v1942_v45, %v1846_v15 }
0x1959   :  { %1877 = vst [vmem:[%s2962_s9 + $0x18] sm:$0xff] %v1855_v53 }
0x195a   :  { %1875 = vst [vmem:[%s2962_s9 + $0x8] sm:$0xff] %v1847_v55 }
0x19c1   :  { %v2247_v57 = vpop.f32.mrb[36].mxu0 }
0x19c2   :  { %v1868_v58 = vadd.f32 %v2247_v57, %v1942_v45  ;;  %v1859_v59 = vpop.f32.mrb[37].mxu0 }
0x19c3   :  { %v1860_v13 = vadd.f32 %v1942_v45, %v1859_v59  ;;  %v2248_v60 = vpop.f32.mrb[38].mxu0 }
0x19c4   :  { %1880 = vst [vmem:[%s2962_s9 + $0x30] sm:$0xff] %v1868_v58  ;;  %v1871_v61 = vadd.f32 %v2248_v60, %v1942_v45  ;;  %v1862_v62 = vpop.f32.mrb[39].mxu0 }
0x19c5   :  { %1878 = vst [vmem:[%s2962_s9 + $0x20] sm:$0xff] %v1860_v13  ;;  %v1863_v63 = vadd.f32 %v1942_v45, %v1862_v62 }
0x19c6   :  { %1881 = vst [vmem:[%s2962_s9 + $0x38] sm:$0xff] %v1871_v61 }
0x19c7   :  { %1879 = vst [vmem:[%s2962_s9 + $0x28] sm:$0xff] %v1863_v63 }

</bundles_post_ra>
